<compile_context>
chip_gen: v7x
topology: tpu7x:2x2x1
jax: 0.10.0
libtpu: 0.0.40
codegen_flags: <defaults>
</compile_context>

<pallas_src>
import jax
import jax.numpy as jnp
from jax.experimental import pallas as pl
from jax.experimental.pallas import tpu as pltpu

# ---- module hyper-parameters (small, synthetic) -------------------------------
B = 8                      # batch
T = 8                      # sequence length stepped by the kernel grid
INPUT_SIZE = 64            # input_size
HEAD_SIZE = 32             # head_size
NUM_HEADS = 4              # num_heads
HIDDEN = HEAD_SIZE * NUM_HEADS            # 128
GATE = 4 * HIDDEN                         # 512
KCAT = 2 * HIDDEN                         # 256 = padded-input(128) + hidden(128)
PROJ = int(HIDDEN * (4.0 / 3.0))          # 170 (proj_factor = 4/3)
PROJ_PAD = 256                            # lane-aligned padded projection size
EPS = 1e-5                                # LayerNorm / GroupNorm eps


# ---- helpers used inside the kernel -------------------------------------------
def _erf(x):
    # Exact-GELU needs erf; Abramowitz & Stegun 7.1.26 polynomial (|err| < 1.5e-7).
    # TODO(synk): replace with lax.erf if a Mosaic lowering for erf_p is guaranteed.
    a1, a2, a3, a4, a5 = 0.254829592, -0.284496736, 1.421413741, -1.453152027, 1.061405429
    p = 0.3275911
    s = jnp.where(x >= 0.0, 1.0, -1.0)
    ax = jnp.abs(x)
    t = 1.0 / (1.0 + p * ax)
    poly = t * (a1 + t * (a2 + t * (a3 + t * (a4 + t * a5))))
    return s * (1.0 - poly * jnp.exp(-ax * ax))


def _gelu_exact(x):
    # F.gelu default (approximate='none'): 0.5 * x * (1 + erf(x / sqrt(2)))
    return 0.5 * x * (1.0 + _erf(x * 0.7071067811865476))


# ---- fused per-timestep kernel (grid axis = time) -------------------------------
def slstm_block_kernel(
    # streamed input
    x_ref,
    # initial state (resident, read once at t==0)
    h0_ref, c0_ref, m0_ref, n0_ref,
    # resident weights
    ln_w_ref, ln_b_ref,
    w_cat_ref, bg_ref,
    gn_a_ref, gn_w_ref, gn_b_ref,
    wu_ref, bu_ref, wd_ref, bd_ref,
    # outputs
    out_ref, hn_ref, cn_ref, mn_ref, nn_ref,
    # VMEM scratch carried across grid steps
    xh_s, c_s, m_s, n_s,
):
    t = pl.program_id(0)

    @pl.when(t == 0)
    def _init():
        # xh_s cols [0,64): xn(t) (rewritten every step), [64,128): zero padding,
        # [128,256): carried hidden state h(t).
        xh_s[...] = jnp.zeros_like(xh_s)
        xh_s[:, HIDDEN:] = h0_ref[...]
        c_s[...] = c0_ref[...]
        m_s[...] = m0_ref[...]
        n_s[...] = n0_ref[...]

    x = x_ref[0]                      # (B, INPUT_SIZE)
    skip = x

    # --- LayerNorm over input_size (f32) ---
    mu = jnp.mean(x, axis=-1, keepdims=True)
    var = jnp.mean(jnp.square(x - mu), axis=-1, keepdims=True)
    xn = (x - mu) * jax.lax.rsqrt(var + EPS) * ln_w_ref[...] + ln_b_ref[...]

    # --- fused sLSTM gate matmul: [xn_pad | h] @ [W_i_pad ; W_hd] ---
    xh_s[:, 0:INPUT_SIZE] = xn        # lane-aligned partial store; cols 64:128 stay 0
    xh = xh_s[...]                    # (B, 256) f32
    h = xh[:, HIDDEN:]                # previous hidden state (f32)
    c = c_s[...]
    m = m_s[...]
    n = n_s[...]

    gates = (
        jnp.dot(xh.astype(jnp.bfloat16), w_cat_ref[...],
                preferred_element_type=jnp.float32)
        + bg_ref[...]
    )                                  # (B, 512), f32 accumulation

    H = HIDDEN
    i_t = gates[:, 0 * H:1 * H]
    f_t = gates[:, 1 * H:2 * H]
    z_t = gates[:, 2 * H:3 * H]
    o_t = gates[:, 3 * H:4 * H]

    m_next = jnp.maximum(f_t + m, i_t)
    i_g = jnp.exp(i_t - m_next)
    f_g = jnp.exp(f_t - m_next + m)
    z = jnp.tanh(z_t)
    o = jax.nn.sigmoid(o_t)
    c_next = f_g * c + i_g * z
    n_next = f_g * n + i_g
    # divide on the EUP slot (co-issues with the surrounding VALU work)
    h_next = o * (c_next * pl.reciprocal(n_next, approx=True))

    # --- GroupNorm(num_heads, hidden): two dense (B,128)x(128,128) matmuls ---
    # A = G G^T / head_size; centered two-pass variance (numerically safe).
    a = gn_a_ref[...]
    mean_c = jnp.dot(h_next, a, preferred_element_type=jnp.float32)
    cent = h_next - mean_c
    var_c = jnp.dot(cent * cent, a, preferred_element_type=jnp.float32)
    xg = cent * jax.lax.rsqrt(var_c + EPS) * gn_w_ref[...] + gn_b_ref[...]

    # --- fused, lane-padded up-proj -> gated exact-GELU -> down-proj -> residual ---
    u = (jnp.dot(xg.astype(jnp.bfloat16), wu_ref[...],
                 preferred_element_type=jnp.float32) + bu_ref[...])   # (B, 512)
    u1 = u[:, :PROJ_PAD]
    u2 = u[:, PROJ_PAD:]
    y = u1 * _gelu_exact(u2)          # padded cols are exactly zero

    out = (jnp.dot(y.astype(jnp.bfloat16), wd_ref[...],
                   preferred_element_type=jnp.float32)
           + bd_ref[...] + skip)

    # --- outputs ---
    out_ref[0] = out                  # streamed per step
    hn_ref[...] = h_next              # resident; written back to HBM once at the end
    cn_ref[...] = c_next
    mn_ref[...] = m_next
    nn_ref[...] = n_next

    # --- carry recurrent state to the next grid step (stays in VMEM) ---
    xh_s[:, HIDDEN:] = h_next
    c_s[...] = c_next
    m_s[...] = m_next
    n_s[...] = n_next


# ---- wrapper --------------------------------------------------------------------
def _resident(shape):
    nd = len(shape)
    return pl.BlockSpec(shape, lambda t, _n=nd: (0,) * _n)


def _streamed():
    return pl.BlockSpec((1, B, INPUT_SIZE), lambda t: (t, 0, 0))


def slstm_block_seq(x_seq, h0, c0, m0, n0, kp):
    """Runs the SLSTMBlock forward over a (T, B, input) sequence in one kernel."""
    t_steps = x_seq.shape[0]
    inputs = (
        x_seq, h0, c0, m0, n0,
        kp["ln_w"], kp["ln_b"],
        kp["W_cat"], kp["b_gates"],
        kp["A_gn"], kp["gn_w"], kp["gn_b"],
        kp["Wu_cat"], kp["bu_cat"], kp["Wd_pad"], kp["bd"],
    )
    in_specs = [_streamed()] + [_resident(a.shape) for a in inputs[1:]]
    out_shape = (
        jax.ShapeDtypeStruct((t_steps, B, INPUT_SIZE), jnp.float32),  # block output
        jax.ShapeDtypeStruct((B, HIDDEN), jnp.float32),               # h_T
        jax.ShapeDtypeStruct((B, HIDDEN), jnp.float32),               # c_T
        jax.ShapeDtypeStruct((B, HIDDEN), jnp.float32),               # m_T
        jax.ShapeDtypeStruct((B, HIDDEN), jnp.float32),               # n_T
    )
    out_specs = (
        _streamed(),
        _resident((B, HIDDEN)), _resident((B, HIDDEN)),
        _resident((B, HIDDEN)), _resident((B, HIDDEN)),
    )
    return pl.pallas_call(
        slstm_block_kernel,
        grid=(t_steps,),
        in_specs=in_specs,
        out_specs=out_specs,
        out_shape=out_shape,
        scratch_shapes=[
            pltpu.VMEM((B, KCAT), jnp.float32),    # [xn_pad | h] gate-input buffer
            pltpu.VMEM((B, HIDDEN), jnp.float32),  # c state
            pltpu.VMEM((B, HIDDEN), jnp.float32),  # m state
            pltpu.VMEM((B, HIDDEN), jnp.float32),  # n state
        ],
        compiler_params=pltpu.CompilerParams(
            dimension_semantics=("arbitrary",)),   # sequential recurrence over time
    )(*inputs)


# ---- parameter init (module shapes) + packing for the kernel ---------------------
def init_params(key):
    ks = jax.random.split(key, 6)

    std_wi = (2.0 / (INPUT_SIZE + 4 * HIDDEN)) ** 0.5             # xavier_normal_
    W_i = jax.random.normal(ks[0], (INPUT_SIZE, 4 * HIDDEN), jnp.float32) * std_wi

    std_wh = (2.0 / (HEAD_SIZE + 4 * HEAD_SIZE)) ** 0.5           # xavier_normal_ per head
    W_h = jax.random.normal(ks[1], (NUM_HEADS, HEAD_SIZE, 4 * HEAD_SIZE), jnp.float32) * std_wh
    # torch.block_diag(*W_h)
    W_hd = jnp.zeros((HIDDEN, 4 * HIDDEN), jnp.float32)
    for k in range(NUM_HEADS):
        W_hd = W_hd.at[k * HEAD_SIZE:(k + 1) * HEAD_SIZE,
                       k * 4 * HEAD_SIZE:(k + 1) * 4 * HEAD_SIZE].set(W_h[k])

    b_gates = jnp.zeros((1, 4 * HIDDEN), jnp.float32)             # b_i + b_h (zero init)
    ln_w = jnp.ones((1, INPUT_SIZE), jnp.float32)
    ln_b = jnp.zeros((1, INPUT_SIZE), jnp.float32)
    gn_w = jnp.ones((1, HIDDEN), jnp.float32)
    gn_b = jnp.zeros((1, HIDDEN), jnp.float32)

    lim_u = 1.0 / (HIDDEN ** 0.5)                                 # nn.Linear default
    Wu = jax.random.uniform(ks[2], (HIDDEN, 2 * PROJ), jnp.float32, -lim_u, lim_u)
    bu = jax.random.uniform(ks[3], (1, 2 * PROJ), jnp.float32, -lim_u, lim_u)
    lim_d = 1.0 / (PROJ ** 0.5)
    Wd = jax.random.uniform(ks[4], (PROJ, INPUT_SIZE), jnp.float32, -lim_d, lim_d)
    bd = jax.random.uniform(ks[5], (1, INPUT_SIZE), jnp.float32, -lim_d, lim_d)

    return dict(ln_w=ln_w, ln_b=ln_b, W_i=W_i, W_hd=W_hd, b_gates=b_gates,
                gn_w=gn_w, gn_b=gn_b,
                Wu1=Wu[:, :PROJ], Wu2=Wu[:, PROJ:], bu1=bu[:, :PROJ], bu2=bu[:, PROJ:],
                Wd=Wd, bd=bd)


def pack_params(p):
    """Fuse / pad / cast the logical parameters into the kernel's resident operands."""
    # fused gate weight: [W_i zero-padded to 128 rows ; block_diag(W_h)] -> (256, 512) bf16
    W_i_pad = jnp.zeros((HIDDEN, GATE), jnp.float32).at[:INPUT_SIZE].set(p["W_i"])
    W_cat = jnp.concatenate([W_i_pad, p["W_hd"]], axis=0).astype(jnp.bfloat16)

    # fused & lane-padded up-projection: (128, 2*256) bf16 ; biases padded with zeros
    Wu_cat = jnp.zeros((HIDDEN, 2 * PROJ_PAD), jnp.float32)
    Wu_cat = Wu_cat.at[:, :PROJ].set(p["Wu1"]).at[:, PROJ_PAD:PROJ_PAD + PROJ].set(p["Wu2"])
    bu_cat = jnp.zeros((1, 2 * PROJ_PAD), jnp.float32)
    bu_cat = bu_cat.at[:, :PROJ].set(p["bu1"]).at[:, PROJ_PAD:PROJ_PAD + PROJ].set(p["bu2"])
    Wd_pad = jnp.zeros((PROJ_PAD, INPUT_SIZE), jnp.float32).at[:PROJ].set(p["Wd"])

    # GroupNorm group-averaging matrix: A[i,j] = 1/head_size if same head else 0
    grp = jnp.arange(HIDDEN) // HEAD_SIZE
    A_gn = (grp[:, None] == grp[None, :]).astype(jnp.float32) / float(HEAD_SIZE)

    return dict(ln_w=p["ln_w"], ln_b=p["ln_b"],
                W_cat=W_cat, b_gates=p["b_gates"],
                A_gn=A_gn, gn_w=p["gn_w"], gn_b=p["gn_b"],
                Wu_cat=Wu_cat.astype(jnp.bfloat16), bu_cat=bu_cat,
                Wd_pad=Wd_pad.astype(jnp.bfloat16), bd=p["bd"])


# ---- pure-JAX f32 reference (same semantics as the PyTorch module, stepped T times) --
def reference_seq(x_seq, h, c, m, n, p):
    hp = jax.lax.Precision.HIGHEST
    outs = []
    for t in range(x_seq.shape[0]):
        x = x_seq[t]
        skip = x
        mu = jnp.mean(x, -1, keepdims=True)
        var = jnp.mean((x - mu) ** 2, -1, keepdims=True)
        xn = (x - mu) / jnp.sqrt(var + EPS) * p["ln_w"] + p["ln_b"]

        gates = (jnp.dot(xn, p["W_i"], precision=hp)
                 + jnp.dot(h, p["W_hd"], precision=hp) + p["b_gates"])
        i_t, f_t, z_t, o_t = jnp.split(gates, 4, axis=-1)
        m_next = jnp.maximum(f_t + m, i_t)
        i_g = jnp.exp(i_t - m_next)
        f_g = jnp.exp(f_t - m_next + m)
        z = jnp.tanh(z_t)
        o = jax.nn.sigmoid(o_t)
        c = f_g * c + i_g * z
        n = f_g * n + i_g
        h = o * (c / n)
        m = m_next

        hr = h.reshape(B, NUM_HEADS, HEAD_SIZE)
        mg = hr.mean(-1, keepdims=True)
        vg = ((hr - mg) ** 2).mean(-1, keepdims=True)
        xg = ((hr - mg) / jnp.sqrt(vg + EPS)).reshape(B, HIDDEN) * p["gn_w"] + p["gn_b"]

        u1 = jnp.dot(xg, p["Wu1"], precision=hp) + p["bu1"]
        u2 = jnp.dot(xg, p["Wu2"], precision=hp) + p["bu2"]
        y = u1 * jax.nn.gelu(u2, approximate=False)
        outs.append(jnp.dot(y, p["Wd"], precision=hp) + p["bd"] + skip)
    return jnp.stack(outs), h, c, m, n


if __name__ == "__main__":
    key = jax.random.PRNGKey(0)
    kx, kh, kc, km, kn, kp = jax.random.split(key, 6)
    x_seq = jax.random.normal(kx, (T, B, INPUT_SIZE), jnp.float32)
    h0 = jax.random.normal(kh, (B, HIDDEN), jnp.float32) * 0.1
    c0 = jax.random.normal(kc, (B, HIDDEN), jnp.float32) * 0.1
    m0 = jax.random.normal(km, (B, HIDDEN), jnp.float32) * 0.1
    n0 = jnp.abs(jax.random.normal(kn, (B, HIDDEN), jnp.float32)) + 1.0  # normalizer > 0

    params = init_params(kp)
    packed = pack_params(params)

    outs = slstm_block_seq(x_seq, h0, c0, m0, n0, packed)
    outs = jax.block_until_ready(outs)

    refs = reference_seq(x_seq, h0, c0, m0, n0, params)
    # Tolerance accounts for bf16 MXU operands (f32 accumulate) and the EUP
    # approximate reciprocal, per the performance review; structure otherwise
    # matches the f32 module semantics exactly.
    for name, got, want in zip(("out", "h", "c", "m", "n"), outs, refs):
        assert got.shape == want.shape and got.dtype == want.dtype, name
        max_err = float(jnp.max(jnp.abs(got - want)))
        assert jnp.allclose(got, want, atol=3e-2, rtol=3e-2), (name, max_err)

    print("KERNEL_OK")
</pallas_src>

<mosaic_0001>
module attributes {stable_mosaic.version = 11 : i64} {
  func.func @slstm_block_kernel(%arg0: i32, %arg1: memref<1x8x64xf32, #tpu.memory_space<vmem>>, %arg2: memref<8x128xf32, #tpu.memory_space<vmem>>, %arg3: memref<8x128xf32, #tpu.memory_space<vmem>>, %arg4: memref<8x128xf32, #tpu.memory_space<vmem>>, %arg5: memref<8x128xf32, #tpu.memory_space<vmem>>, %arg6: memref<1x64xf32, #tpu.memory_space<vmem>>, %arg7: memref<1x64xf32, #tpu.memory_space<vmem>>, %arg8: memref<256x512xbf16, #tpu.memory_space<vmem>>, %arg9: memref<1x512xf32, #tpu.memory_space<vmem>>, %arg10: memref<128x128xf32, #tpu.memory_space<vmem>>, %arg11: memref<1x128xf32, #tpu.memory_space<vmem>>, %arg12: memref<1x128xf32, #tpu.memory_space<vmem>>, %arg13: memref<128x512xbf16, #tpu.memory_space<vmem>>, %arg14: memref<1x512xf32, #tpu.memory_space<vmem>>, %arg15: memref<256x64xbf16, #tpu.memory_space<vmem>>, %arg16: memref<1x64xf32, #tpu.memory_space<vmem>>, %arg17: memref<1x8x64xf32, #tpu.memory_space<vmem>>, %arg18: memref<8x128xf32, #tpu.memory_space<vmem>>, %arg19: memref<8x128xf32, #tpu.memory_space<vmem>>, %arg20: memref<8x128xf32, #tpu.memory_space<vmem>>, %arg21: memref<8x128xf32, #tpu.memory_space<vmem>>, %arg22: memref<8x256xf32, #tpu.memory_space<vmem>>, %arg23: memref<8x128xf32, #tpu.memory_space<vmem>>, %arg24: memref<8x128xf32, #tpu.memory_space<vmem>>, %arg25: memref<8x128xf32, #tpu.memory_space<vmem>>) attributes {dimension_semantics = [#tpu.dimension_semantics<arbitrary>], iteration_bounds = array<i64: 8>, scalar_prefetch = 0 : i64, scratch_operands = 4 : i64, tpu.core_type = #tpu.core_type<tc>, window_params = [{transform_indices = @transform_0, window_bounds = array<i64: 1, 8, 64>}, {pipeline_mode = #tpu.pipeline_mode<synchronous>, transform_indices = @transform_1, window_bounds = array<i64: 8, 128>}, {pipeline_mode = #tpu.pipeline_mode<synchronous>, transform_indices = @transform_2, window_bounds = array<i64: 8, 128>}, {pipeline_mode = #tpu.pipeline_mode<synchronous>, transform_indices = @transform_3, window_bounds = array<i64: 8, 128>}, {pipeline_mode = #tpu.pipeline_mode<synchronous>, transform_indices = @transform_4, window_bounds = array<i64: 8, 128>}, {pipeline_mode = #tpu.pipeline_mode<synchronous>, transform_indices = @transform_5, window_bounds = array<i64: 1, 64>}, {pipeline_mode = #tpu.pipeline_mode<synchronous>, transform_indices = @transform_6, window_bounds = array<i64: 1, 64>}, {pipeline_mode = #tpu.pipeline_mode<synchronous>, transform_indices = @transform_7, window_bounds = array<i64: 256, 512>}, {pipeline_mode = #tpu.pipeline_mode<synchronous>, transform_indices = @transform_8, window_bounds = array<i64: 1, 512>}, {pipeline_mode = #tpu.pipeline_mode<synchronous>, transform_indices = @transform_9, window_bounds = array<i64: 128, 128>}, {pipeline_mode = #tpu.pipeline_mode<synchronous>, transform_indices = @transform_10, window_bounds = array<i64: 1, 128>}, {pipeline_mode = #tpu.pipeline_mode<synchronous>, transform_indices = @transform_11, window_bounds = array<i64: 1, 128>}, {pipeline_mode = #tpu.pipeline_mode<synchronous>, transform_indices = @transform_12, window_bounds = array<i64: 128, 512>}, {pipeline_mode = #tpu.pipeline_mode<synchronous>, transform_indices = @transform_13, window_bounds = array<i64: 1, 512>}, {pipeline_mode = #tpu.pipeline_mode<synchronous>, transform_indices = @transform_14, window_bounds = array<i64: 256, 64>}, {pipeline_mode = #tpu.pipeline_mode<synchronous>, transform_indices = @transform_15, window_bounds = array<i64: 1, 64>}, {transform_indices = @transform_16, window_bounds = array<i64: 1, 8, 64>}, {pipeline_mode = #tpu.pipeline_mode<synchronous>, transform_indices = @transform_17, window_bounds = array<i64: 8, 128>}, {pipeline_mode = #tpu.pipeline_mode<synchronous>, transform_indices = @transform_18, window_bounds = array<i64: 8, 128>}, {pipeline_mode = #tpu.pipeline_mode<synchronous>, transform_indices = @transform_19, window_bounds = array<i64: 8, 128>}, {pipeline_mode = #tpu.pipeline_mode<synchronous>, transform_indices = @transform_20, window_bounds = array<i64: 8, 128>}]} {
    %c0_i32 = arith.constant 0 : i32
    %0 = arith.cmpi eq, %arg0, %c0_i32 : i32
    %1 = arith.extui %0 : i1 to i32
    %c0_i32_0 = arith.constant 0 : i32
    %2 = arith.cmpi ne, %1, %c0_i32_0 : i32
    scf.if %2 {
      %cst_80 = arith.constant 0.000000e+00 : f32
      %148 = vector.broadcast %cst_80 : f32 to vector<8x256xf32>
      %c0_81 = arith.constant 0 : index
      %c0_82 = arith.constant 0 : index
      %149 = vector.load %arg22[%c0_81, %c0_82] : memref<8x256xf32, #tpu.memory_space<vmem>>, vector<8x256xf32>
      tpu.vector_store %arg22[%c0_81, %c0_82], %148 {strides = array<i32>} : memref<8x256xf32, #tpu.memory_space<vmem>>, vector<8x256xf32>,
      %c0_83 = arith.constant 0 : index
      %c0_84 = arith.constant 0 : index
      %150 = vector.load %arg2[%c0_83, %c0_84] : memref<8x128xf32, #tpu.memory_space<vmem>>, vector<8x128xf32>
      %c0_85 = arith.constant 0 : index
      %c128_86 = arith.constant 128 : index
      %151 = vector.load %arg22[%c0_85, %c128_86] : memref<8x256xf32, #tpu.memory_space<vmem>>, vector<8x128xf32>
      tpu.vector_store %arg22[%c0_85, %c128_86], %150 {strides = array<i32>} : memref<8x256xf32, #tpu.memory_space<vmem>>, vector<8x128xf32>,
      %c0_87 = arith.constant 0 : index
      %c0_88 = arith.constant 0 : index
      %152 = vector.load %arg3[%c0_87, %c0_88] : memref<8x128xf32, #tpu.memory_space<vmem>>, vector<8x128xf32>
      %c0_89 = arith.constant 0 : index
      %c0_90 = arith.constant 0 : index
      %153 = vector.load %arg23[%c0_89, %c0_90] : memref<8x128xf32, #tpu.memory_space<vmem>>, vector<8x128xf32>
      tpu.vector_store %arg23[%c0_89, %c0_90], %152 {strides = array<i32>} : memref<8x128xf32, #tpu.memory_space<vmem>>, vector<8x128xf32>,
      %c0_91 = arith.constant 0 : index
      %c0_92 = arith.constant 0 : index
      %154 = vector.load %arg4[%c0_91, %c0_92] : memref<8x128xf32, #tpu.memory_space<vmem>>, vector<8x128xf32>
      %c0_93 = arith.constant 0 : index
      %c0_94 = arith.constant 0 : index
      %155 = vector.load %arg24[%c0_93, %c0_94] : memref<8x128xf32, #tpu.memory_space<vmem>>, vector<8x128xf32>
      tpu.vector_store %arg24[%c0_93, %c0_94], %154 {strides = array<i32>} : memref<8x128xf32, #tpu.memory_space<vmem>>, vector<8x128xf32>,
      %c0_95 = arith.constant 0 : index
      %c0_96 = arith.constant 0 : index
      %156 = vector.load %arg5[%c0_95, %c0_96] : memref<8x128xf32, #tpu.memory_space<vmem>>, vector<8x128xf32>
      %c0_97 = arith.constant 0 : index
      %c0_98 = arith.constant 0 : index
      %157 = vector.load %arg25[%c0_97, %c0_98] : memref<8x128xf32, #tpu.memory_space<vmem>>, vector<8x128xf32>
      tpu.vector_store %arg25[%c0_97, %c0_98], %156 {strides = array<i32>} : memref<8x128xf32, #tpu.memory_space<vmem>>, vector<8x128xf32>,
    } else {
    }
    %c0 = arith.constant 0 : index
    %c0_1 = arith.constant 0 : index
    %c0_2 = arith.constant 0 : index
    %3 = vector.load %arg1[%c0, %c0_1, %c0_2] : memref<1x8x64xf32, #tpu.memory_space<vmem>>, vector<1x8x64xf32>
    %4 = vector.shape_cast %3 : vector<1x8x64xf32> to vector<8x64xf32>
    %cst = arith.constant dense<0.000000e+00> : vector<8xf32>
    %5 = vector.multi_reduction <add>, %4, %cst [1] : vector<8x64xf32> to vector<8xf32>
    %6 = vector.shape_cast %5 : vector<8xf32> to vector<8x1xf32>
    %cst_3 = arith.constant 6.400000e+01 : f32
    %7 = vector.broadcast %cst_3 : f32 to vector<8x1xf32>
    %8 = arith.divf %6, %7 : vector<8x1xf32>
    %9 = vector.broadcast %8 : vector<8x1xf32> to vector<8x64xf32>
    %10 = arith.subf %4, %9 : vector<8x64xf32>
    %11 = arith.mulf %10, %10 : vector<8x64xf32>
    %cst_4 = arith.constant dense<0.000000e+00> : vector<8xf32>
    %12 = vector.multi_reduction <add>, %11, %cst_4 [1] : vector<8x64xf32> to vector<8xf32>
    %13 = vector.shape_cast %12 : vector<8xf32> to vector<8x1xf32>
    %cst_5 = arith.constant 6.400000e+01 : f32
    %14 = vector.broadcast %cst_5 : f32 to vector<8x1xf32>
    %15 = arith.divf %13, %14 : vector<8x1xf32>
    %16 = vector.broadcast %8 : vector<8x1xf32> to vector<8x64xf32>
    %17 = arith.subf %4, %16 : vector<8x64xf32>
    %cst_6 = arith.constant 9.99999974E-6 : f32
    %18 = vector.broadcast %cst_6 : f32 to vector<8x1xf32>
    %19 = arith.addf %15, %18 : vector<8x1xf32>
    %20 = math.rsqrt %19 : vector<8x1xf32>
    %21 = vector.broadcast %20 : vector<8x1xf32> to vector<8x64xf32>
    %22 = arith.mulf %17, %21 : vector<8x64xf32>
    %c0_7 = arith.constant 0 : index
    %c0_8 = arith.constant 0 : index
    %23 = vector.load %arg6[%c0_7, %c0_8] : memref<1x64xf32, #tpu.memory_space<vmem>>, vector<1x64xf32>
    %24 = vector.broadcast %23 : vector<1x64xf32> to vector<8x64xf32>
    %25 = arith.mulf %22, %24 : vector<8x64xf32>
    %c0_9 = arith.constant 0 : index
    %c0_10 = arith.constant 0 : index
    %26 = vector.load %arg7[%c0_9, %c0_10] : memref<1x64xf32, #tpu.memory_space<vmem>>, vector<1x64xf32>
    %27 = vector.broadcast %26 : vector<1x64xf32> to vector<8x64xf32>
    %28 = arith.addf %25, %27 : vector<8x64xf32>
    %c0_11 = arith.constant 0 : index
    %c0_12 = arith.constant 0 : index
    %29 = vector.load %arg22[%c0_11, %c0_12] : memref<8x256xf32, #tpu.memory_space<vmem>>, vector<8x64xf32>
    tpu.vector_store %arg22[%c0_11, %c0_12], %28 {strides = array<i32>} : memref<8x256xf32, #tpu.memory_space<vmem>>, vector<8x64xf32>,
    %c0_13 = arith.constant 0 : index
    %c0_14 = arith.constant 0 : index
    %30 = vector.load %arg22[%c0_13, %c0_14] : memref<8x256xf32, #tpu.memory_space<vmem>>, vector<8x256xf32>
    %c0_15 = arith.constant 0 : index
    %c0_16 = arith.constant 0 : index
    %31 = vector.load %arg23[%c0_15, %c0_16] : memref<8x128xf32, #tpu.memory_space<vmem>>, vector<8x128xf32>
    %c0_17 = arith.constant 0 : index
    %c0_18 = arith.constant 0 : index
    %32 = vector.load %arg24[%c0_17, %c0_18] : memref<8x128xf32, #tpu.memory_space<vmem>>, vector<8x128xf32>
    %c0_19 = arith.constant 0 : index
    %c0_20 = arith.constant 0 : index
    %33 = vector.load %arg25[%c0_19, %c0_20] : memref<8x128xf32, #tpu.memory_space<vmem>>, vector<8x128xf32>
    %34 = arith.truncf %30 : vector<8x256xf32> to vector<8x256xbf16>
    %c0_21 = arith.constant 0 : index
    %c0_22 = arith.constant 0 : index
    %35 = vector.load %arg8[%c0_21, %c0_22] : memref<256x512xbf16, #tpu.memory_space<vmem>>, vector<256x512xbf16>
    %cst_23 = arith.constant dense<0.000000e+00> : vector<8x512xf32>
    %36 = tpu.matmul %34, %35, %cst_23 {dimension_numbers = #tpu.dot_dimension_numbers<[1], [0], [0], [1], [0, 0, 1, 1], [], []>} : vector<8x256xbf16>, vector<256x512xbf16>, vector<8x512xf32> -> vector<8x512xf32>
    %c0_24 = arith.constant 0 : index
    %c0_25 = arith.constant 0 : index
    %37 = vector.load %arg9[%c0_24, %c0_25] : memref<1x512xf32, #tpu.memory_space<vmem>>, vector<1x512xf32>
    %38 = vector.broadcast %37 : vector<1x512xf32> to vector<8x512xf32>
    %39 = arith.addf %36, %38 : vector<8x512xf32>
    %40 = vector.extract_strided_slice %39 {offsets = [0, 0], sizes = [8, 128], strides = [1, 1]} : vector<8x512xf32> to vector<8x128xf32>
    %41 = vector.extract_strided_slice %39 {offsets = [0, 128], sizes = [8, 128], strides = [1, 1]} : vector<8x512xf32> to vector<8x128xf32>
    %42 = vector.extract_strided_slice %39 {offsets = [0, 256], sizes = [8, 128], strides = [1, 1]} : vector<8x512xf32> to vector<8x128xf32>
    %43 = vector.extract_strided_slice %39 {offsets = [0, 384], sizes = [8, 128], strides = [1, 1]} : vector<8x512xf32> to vector<8x128xf32>
    %44 = arith.addf %41, %32 : vector<8x128xf32>
    %45 = arith.maximumf %44, %40 : vector<8x128xf32>
    %46 = arith.subf %40, %45 : vector<8x128xf32>
    %47 = math.exp %46 : vector<8x128xf32>
    %48 = arith.subf %41, %45 : vector<8x128xf32>
    %49 = arith.addf %48, %32 : vector<8x128xf32>
    %50 = math.exp %49 : vector<8x128xf32>
    %51 = math.tanh %42 : vector<8x128xf32>
    %52 = arith.negf %43 : vector<8x128xf32>
    %53 = math.exp %52 : vector<8x128xf32>
    %cst_26 = arith.constant 1.000000e+00 : f32
    %54 = vector.broadcast %cst_26 : f32 to vector<8x128xf32>
    %55 = arith.addf %54, %53 : vector<8x128xf32>
    %56 = arith.divf %54, %55 : vector<8x128xf32>
    %57 = arith.mulf %50, %31 : vector<8x128xf32>
    %58 = arith.mulf %47, %51 : vector<8x128xf32>
    %59 = arith.addf %57, %58 : vector<8x128xf32>
    %60 = arith.mulf %50, %33 : vector<8x128xf32>
    %61 = arith.addf %60, %47 : vector<8x128xf32>
    %62 = tpu.reciprocal %61 {approx = true} : vector<8x128xf32> -> vector<8x128xf32>
    %63 = arith.mulf %59, %62 : vector<8x128xf32>
    %64 = arith.mulf %56, %63 : vector<8x128xf32>
    %c0_27 = arith.constant 0 : index
    %c0_28 = arith.constant 0 : index
    %65 = vector.load %arg10[%c0_27, %c0_28] : memref<128x128xf32, #tpu.memory_space<vmem>>, vector<128x128xf32>
    %cst_29 = arith.constant dense<0.000000e+00> : vector<8x128xf32>
    %66 = tpu.matmul %64, %65, %cst_29 {dimension_numbers = #tpu.dot_dimension_numbers<[1], [0], [0], [1], [0, 0, 1, 1], [], []>} : vector<8x128xf32>, vector<128x128xf32>, vector<8x128xf32> -> vector<8x128xf32>
    %67 = arith.subf %64, %66 : vector<8x128xf32>
    %68 = arith.mulf %67, %67 : vector<8x128xf32>
    %cst_30 = arith.constant dense<0.000000e+00> : vector<8x128xf32>
    %69 = tpu.matmul %68, %65, %cst_30 {dimension_numbers = #tpu.dot_dimension_numbers<[1], [0], [0], [1], [0, 0, 1, 1], [], []>} : vector<8x128xf32>, vector<128x128xf32>, vector<8x128xf32> -> vector<8x128xf32>
    %cst_31 = arith.constant 9.99999974E-6 : f32
    %70 = vector.broadcast %cst_31 : f32 to vector<8x128xf32>
    %71 = arith.addf %69, %70 : vector<8x128xf32>
    %72 = math.rsqrt %71 : vector<8x128xf32>
    %73 = arith.mulf %67, %72 : vector<8x128xf32>
    %c0_32 = arith.constant 0 : index
    %c0_33 = arith.constant 0 : index
    %74 = vector.load %arg11[%c0_32, %c0_33] : memref<1x128xf32, #tpu.memory_space<vmem>>, vector<1x128xf32>
    %75 = vector.broadcast %74 : vector<1x128xf32> to vector<8x128xf32>
    %76 = arith.mulf %73, %75 : vector<8x128xf32>
    %c0_34 = arith.constant 0 : index
    %c0_35 = arith.constant 0 : index
    %77 = vector.load %arg12[%c0_34, %c0_35] : memref<1x128xf32, #tpu.memory_space<vmem>>, vector<1x128xf32>
    %78 = vector.broadcast %77 : vector<1x128xf32> to vector<8x128xf32>
    %79 = arith.addf %76, %78 : vector<8x128xf32>
    %80 = arith.truncf %79 : vector<8x128xf32> to vector<8x128xbf16>
    %c0_36 = arith.constant 0 : index
    %c0_37 = arith.constant 0 : index
    %81 = vector.load %arg13[%c0_36, %c0_37] : memref<128x512xbf16, #tpu.memory_space<vmem>>, vector<128x512xbf16>
    %cst_38 = arith.constant dense<0.000000e+00> : vector<8x512xf32>
    %82 = tpu.matmul %80, %81, %cst_38 {dimension_numbers = #tpu.dot_dimension_numbers<[1], [0], [0], [1], [0, 0, 1, 1], [], []>} : vector<8x128xbf16>, vector<128x512xbf16>, vector<8x512xf32> -> vector<8x512xf32>
    %c0_39 = arith.constant 0 : index
    %c0_40 = arith.constant 0 : index
    %83 = vector.load %arg14[%c0_39, %c0_40] : memref<1x512xf32, #tpu.memory_space<vmem>>, vector<1x512xf32>
    %84 = vector.broadcast %83 : vector<1x512xf32> to vector<8x512xf32>
    %85 = arith.addf %82, %84 : vector<8x512xf32>
    %86 = vector.extract_strided_slice %85 {offsets = [0, 0], sizes = [8, 256], strides = [1, 1]} : vector<8x512xf32> to vector<8x256xf32>
    %87 = vector.extract_strided_slice %85 {offsets = [0, 256], sizes = [8, 256], strides = [1, 1]} : vector<8x512xf32> to vector<8x256xf32>
    %cst_41 = arith.constant 5.000000e-01 : f32
    %88 = vector.broadcast %cst_41 : f32 to vector<8x256xf32>
    %89 = arith.mulf %88, %87 : vector<8x256xf32>
    %cst_42 = arith.constant 0.707106769 : f32
    %90 = vector.broadcast %cst_42 : f32 to vector<8x256xf32>
    %91 = arith.mulf %87, %90 : vector<8x256xf32>
    %cst_43 = arith.constant 0.000000e+00 : f32
    %92 = vector.broadcast %cst_43 : f32 to vector<8x256xf32>
    %93 = arith.cmpf oge, %91, %92 : vector<8x256xf32>
    %cst_44 = arith.constant 1.000000e+00 : f32
    %cst_45 = arith.constant -1.000000e+00 : f32
    %94 = vector.broadcast %cst_44 : f32 to vector<8x256xf32>
    %95 = vector.broadcast %cst_45 : f32 to vector<8x256xf32>
    %96 = arith.select %93, %94, %95 : vector<8x256xi1>, vector<8x256xf32>
    %97 = math.absf %91 : vector<8x256xf32>
    %cst_46 = arith.constant 0.327591091 : f32
    %98 = vector.broadcast %cst_46 : f32 to vector<8x256xf32>
    %99 = arith.mulf %98, %97 : vector<8x256xf32>
    %cst_47 = arith.constant 1.000000e+00 : f32
    %100 = vector.broadcast %cst_47 : f32 to vector<8x256xf32>
    %101 = arith.addf %100, %99 : vector<8x256xf32>
    %cst_48 = arith.constant 1.000000e+00 : f32
    %102 = vector.broadcast %cst_48 : f32 to vector<8x256xf32>
    %103 = arith.divf %102, %101 : vector<8x256xf32>
    %cst_49 = arith.constant 1.06140542 : f32
    %104 = vector.broadcast %cst_49 : f32 to vector<8x256xf32>
    %105 = arith.mulf %103, %104 : vector<8x256xf32>
    %cst_50 = arith.constant -1.45315206 : f32
    %106 = vector.broadcast %cst_50 : f32 to vector<8x256xf32>
    %107 = arith.addf %106, %105 : vector<8x256xf32>
    %108 = arith.mulf %103, %107 : vector<8x256xf32>
    %cst_51 = arith.constant 1.42141378 : f32
    %109 = vector.broadcast %cst_51 : f32 to vector<8x256xf32>
    %110 = arith.addf %109, %108 : vector<8x256xf32>
    %111 = arith.mulf %103, %110 : vector<8x256xf32>
    %cst_52 = arith.constant -0.284496725 : f32
    %112 = vector.broadcast %cst_52 : f32 to vector<8x256xf32>
    %113 = arith.addf %112, %111 : vector<8x256xf32>
    %114 = arith.mulf %103, %113 : vector<8x256xf32>
    %cst_53 = arith.constant 0.254829586 : f32
    %115 = vector.broadcast %cst_53 : f32 to vector<8x256xf32>
    %116 = arith.addf %115, %114 : vector<8x256xf32>
    %117 = arith.mulf %103, %116 : vector<8x256xf32>
    %cst_54 = arith.constant 0.000000e+00 : f32
    %118 = vector.broadcast %cst_54 : f32 to vector<8x256xf32>
    %119 = arith.subf %118, %97 : vector<8x256xf32>
    %120 = arith.mulf %119, %97 : vector<8x256xf32>
    %121 = math.exp %120 : vector<8x256xf32>
    %122 = arith.mulf %117, %121 : vector<8x256xf32>
    %cst_55 = arith.constant 1.000000e+00 : f32
    %123 = vector.broadcast %cst_55 : f32 to vector<8x256xf32>
    %124 = arith.subf %123, %122 : vector<8x256xf32>
    %125 = arith.mulf %96, %124 : vector<8x256xf32>
    %cst_56 = arith.constant 1.000000e+00 : f32
    %126 = vector.broadcast %cst_56 : f32 to vector<8x256xf32>
    %127 = arith.addf %126, %125 : vector<8x256xf32>
    %128 = arith.mulf %89, %127 : vector<8x256xf32>
    %129 = arith.mulf %86, %128 : vector<8x256xf32>
    %130 = arith.truncf %129 : vector<8x256xf32> to vector<8x256xbf16>
    %c0_57 = arith.constant 0 : index
    %c0_58 = arith.constant 0 : index
    %131 = vector.load %arg15[%c0_57, %c0_58] : memref<256x64xbf16, #tpu.memory_space<vmem>>, vector<256x64xbf16>
    %cst_59 = arith.constant dense<0.000000e+00> : vector<8x64xf32>
    %132 = tpu.matmul %130, %131, %cst_59 {dimension_numbers = #tpu.dot_dimension_numbers<[1], [0], [0], [1], [0, 0, 1, 1], [], []>} : vector<8x256xbf16>, vector<256x64xbf16>, vector<8x64xf32> -> vector<8x64xf32>
    %c0_60 = arith.constant 0 : index
    %c0_61 = arith.constant 0 : index
    %133 = vector.load %arg16[%c0_60, %c0_61] : memref<1x64xf32, #tpu.memory_space<vmem>>, vector<1x64xf32>
    %134 = vector.broadcast %133 : vector<1x64xf32> to vector<8x64xf32>
    %135 = arith.addf %132, %134 : vector<8x64xf32>
    %136 = arith.addf %135, %4 : vector<8x64xf32>
    %c0_62 = arith.constant 0 : index
    %c0_63 = arith.constant 0 : index
    %c0_64 = arith.constant 0 : index
    %137 = vector.load %arg17[%c0_62, %c0_63, %c0_64] : memref<1x8x64xf32, #tpu.memory_space<vmem>>, vector<1x8x64xf32>
    %138 = vector.shape_cast %137 : vector<1x8x64xf32> to vector<8x64xf32>
    %139 = vector.shape_cast %136 : vector<8x64xf32> to vector<1x8x64xf32>
    tpu.vector_store %arg17[%c0_62, %c0_63, %c0_64], %139 {strides = array<i32>} : memref<1x8x64xf32, #tpu.memory_space<vmem>>, vector<1x8x64xf32>,
    %c0_65 = arith.constant 0 : index
    %c0_66 = arith.constant 0 : index
    %140 = vector.load %arg18[%c0_65, %c0_66] : memref<8x128xf32, #tpu.memory_space<vmem>>, vector<8x128xf32>
    tpu.vector_store %arg18[%c0_65, %c0_66], %64 {strides = array<i32>} : memref<8x128xf32, #tpu.memory_space<vmem>>, vector<8x128xf32>,
    %c0_67 = arith.constant 0 : index
    %c0_68 = arith.constant 0 : index
    %141 = vector.load %arg19[%c0_67, %c0_68] : memref<8x128xf32, #tpu.memory_space<vmem>>, vector<8x128xf32>
    tpu.vector_store %arg19[%c0_67, %c0_68], %59 {strides = array<i32>} : memref<8x128xf32, #tpu.memory_space<vmem>>, vector<8x128xf32>,
    %c0_69 = arith.constant 0 : index
    %c0_70 = arith.constant 0 : index
    %142 = vector.load %arg20[%c0_69, %c0_70] : memref<8x128xf32, #tpu.memory_space<vmem>>, vector<8x128xf32>
    tpu.vector_store %arg20[%c0_69, %c0_70], %45 {strides = array<i32>} : memref<8x128xf32, #tpu.memory_space<vmem>>, vector<8x128xf32>,
    %c0_71 = arith.constant 0 : index
    %c0_72 = arith.constant 0 : index
    %143 = vector.load %arg21[%c0_71, %c0_72] : memref<8x128xf32, #tpu.memory_space<vmem>>, vector<8x128xf32>
    tpu.vector_store %arg21[%c0_71, %c0_72], %61 {strides = array<i32>} : memref<8x128xf32, #tpu.memory_space<vmem>>, vector<8x128xf32>,
    %c0_73 = arith.constant 0 : index
    %c128 = arith.constant 128 : index
    %144 = vector.load %arg22[%c0_73, %c128] : memref<8x256xf32, #tpu.memory_space<vmem>>, vector<8x128xf32>
    tpu.vector_store %arg22[%c0_73, %c128], %64 {strides = array<i32>} : memref<8x256xf32, #tpu.memory_space<vmem>>, vector<8x128xf32>,
    %c0_74 = arith.constant 0 : index
    %c0_75 = arith.constant 0 : index
    %145 = vector.load %arg23[%c0_74, %c0_75] : memref<8x128xf32, #tpu.memory_space<vmem>>, vector<8x128xf32>
    tpu.vector_store %arg23[%c0_74, %c0_75], %59 {strides = array<i32>} : memref<8x128xf32, #tpu.memory_space<vmem>>, vector<8x128xf32>,
    %c0_76 = arith.constant 0 : index
    %c0_77 = arith.constant 0 : index
    %146 = vector.load %arg24[%c0_76, %c0_77] : memref<8x128xf32, #tpu.memory_space<vmem>>, vector<8x128xf32>
    tpu.vector_store %arg24[%c0_76, %c0_77], %45 {strides = array<i32>} : memref<8x128xf32, #tpu.memory_space<vmem>>, vector<8x128xf32>,
    %c0_78 = arith.constant 0 : index
    %c0_79 = arith.constant 0 : index
    %147 = vector.load %arg25[%c0_78, %c0_79] : memref<8x128xf32, #tpu.memory_space<vmem>>, vector<8x128xf32>
    tpu.vector_store %arg25[%c0_78, %c0_79], %61 {strides = array<i32>} : memref<8x128xf32, #tpu.memory_space<vmem>>, vector<8x128xf32>,
    return
  }
  func.func @transform_0(%arg0: i32) -> (i32, i32, i32) {
    %c0_i32 = arith.constant 0 : i32
    %c0_i32_0 = arith.constant 0 : i32
    %c0_i32_1 = arith.constant 0 : i32
    return %arg0, %c0_i32, %c0_i32_0 : i32, i32, i32
  }
  func.func @transform_1(%arg0: i32) -> (i32, i32) {
    %c0_i32 = arith.constant 0 : i32
    %c0_i32_0 = arith.constant 0 : i32
    %c0_i32_1 = arith.constant 0 : i32
    return %c0_i32, %c0_i32_0 : i32, i32
  }
  func.func @transform_2(%arg0: i32) -> (i32, i32) {
    %c0_i32 = arith.constant 0 : i32
    %c0_i32_0 = arith.constant 0 : i32
    %c0_i32_1 = arith.constant 0 : i32
    return %c0_i32, %c0_i32_0 : i32, i32
  }
  func.func @transform_3(%arg0: i32) -> (i32, i32) {
    %c0_i32 = arith.constant 0 : i32
    %c0_i32_0 = arith.constant 0 : i32
    %c0_i32_1 = arith.constant 0 : i32
    return %c0_i32, %c0_i32_0 : i32, i32
  }
  func.func @transform_4(%arg0: i32) -> (i32, i32) {
    %c0_i32 = arith.constant 0 : i32
    %c0_i32_0 = arith.constant 0 : i32
    %c0_i32_1 = arith.constant 0 : i32
    return %c0_i32, %c0_i32_0 : i32, i32
  }
  func.func @transform_5(%arg0: i32) -> (i32, i32) {
    %c0_i32 = arith.constant 0 : i32
    %c0_i32_0 = arith.constant 0 : i32
    %c0_i32_1 = arith.constant 0 : i32
    return %c0_i32, %c0_i32_0 : i32, i32
  }
  func.func @transform_6(%arg0: i32) -> (i32, i32) {
    %c0_i32 = arith.constant 0 : i32
    %c0_i32_0 = arith.constant 0 : i32
    %c0_i32_1 = arith.constant 0 : i32
    return %c0_i32, %c0_i32_0 : i32, i32
  }
  func.func @transform_7(%arg0: i32) -> (i32, i32) {
    %c0_i32 = arith.constant 0 : i32
    %c0_i32_0 = arith.constant 0 : i32
    %c0_i32_1 = arith.constant 0 : i32
    return %c0_i32, %c0_i32_0 : i32, i32
  }
  func.func @transform_8(%arg0: i32) -> (i32, i32) {
    %c0_i32 = arith.constant 0 : i32
    %c0_i32_0 = arith.constant 0 : i32
    %c0_i32_1 = arith.constant 0 : i32
    return %c0_i32, %c0_i32_0 : i32, i32
  }
  func.func @transform_9(%arg0: i32) -> (i32, i32) {
    %c0_i32 = arith.constant 0 : i32
    %c0_i32_0 = arith.constant 0 : i32
    %c0_i32_1 = arith.constant 0 : i32
    return %c0_i32, %c0_i32_0 : i32, i32
  }
  func.func @transform_10(%arg0: i32) -> (i32, i32) {
    %c0_i32 = arith.constant 0 : i32
    %c0_i32_0 = arith.constant 0 : i32
    %c0_i32_1 = arith.constant 0 : i32
    return %c0_i32, %c0_i32_0 : i32, i32
  }
  func.func @transform_11(%arg0: i32) -> (i32, i32) {
    %c0_i32 = arith.constant 0 : i32
    %c0_i32_0 = arith.constant 0 : i32
    %c0_i32_1 = arith.constant 0 : i32
    return %c0_i32, %c0_i32_0 : i32, i32
  }
  func.func @transform_12(%arg0: i32) -> (i32, i32) {
    %c0_i32 = arith.constant 0 : i32
    %c0_i32_0 = arith.constant 0 : i32
    %c0_i32_1 = arith.constant 0 : i32
    return %c0_i32, %c0_i32_0 : i32, i32
  }
  func.func @transform_13(%arg0: i32) -> (i32, i32) {
    %c0_i32 = arith.constant 0 : i32
    %c0_i32_0 = arith.constant 0 : i32
    %c0_i32_1 = arith.constant 0 : i32
    return %c0_i32, %c0_i32_0 : i32, i32
  }
  func.func @transform_14(%arg0: i32) -> (i32, i32) {
    %c0_i32 = arith.constant 0 : i32
    %c0_i32_0 = arith.constant 0 : i32
    %c0_i32_1 = arith.constant 0 : i32
    return %c0_i32, %c0_i32_0 : i32, i32
  }
  func.func @transform_15(%arg0: i32) -> (i32, i32) {
    %c0_i32 = arith.constant 0 : i32
    %c0_i32_0 = arith.constant 0 : i32
    %c0_i32_1 = arith.constant 0 : i32
    return %c0_i32, %c0_i32_0 : i32, i32
  }
  func.func @transform_16(%arg0: i32) -> (i32, i32, i32) {
    %c0_i32 = arith.constant 0 : i32
    %c0_i32_0 = arith.constant 0 : i32
    %c0_i32_1 = arith.constant 0 : i32
    return %arg0, %c0_i32, %c0_i32_0 : i32, i32, i32
  }
  func.func @transform_17(%arg0: i32) -> (i32, i32) {
    %c0_i32 = arith.constant 0 : i32
    %c0_i32_0 = arith.constant 0 : i32
    %c0_i32_1 = arith.constant 0 : i32
    return %c0_i32, %c0_i32_0 : i32, i32
  }
  func.func @transform_18(%arg0: i32) -> (i32, i32) {
    %c0_i32 = arith.constant 0 : i32
    %c0_i32_0 = arith.constant 0 : i32
    %c0_i32_1 = arith.constant 0 : i32
    return %c0_i32, %c0_i32_0 : i32, i32
  }
  func.func @transform_19(%arg0: i32) -> (i32, i32) {
    %c0_i32 = arith.constant 0 : i32
    %c0_i32_0 = arith.constant 0 : i32
    %c0_i32_1 = arith.constant 0 : i32
    return %c0_i32, %c0_i32_0 : i32, i32
  }
  func.func @transform_20(%arg0: i32) -> (i32, i32) {
    %c0_i32 = arith.constant 0 : i32
    %c0_i32_0 = arith.constant 0 : i32
    %c0_i32_1 = arith.constant 0 : i32
    return %c0_i32, %c0_i32_0 : i32, i32
  }
}

</mosaic_0001>

<bundles_post_ra>
// kernel: tpu_custom_call.1
= control target key start
LH: loop header
LB: loop body
LE: loop exit
PB: predicated region body
PF: predicated region fallthrough
CT: control target
= control target key end

     0   :  { %s3782_s0 = inlined_call_operand.vmem [shape: f32[8,8,64], index: 0, kind: input, shape index: {}]   ;;  %s3783_s1 = inlined_call_operand.vmem [shape: f32[8,128], index: 1, kind: input, shape index: {}]   ;;  %s3784_s2 = inlined_call_operand.vmem [shape: f32[8,128], index: 2, kind: input, shape index: {}]   ;;  %s3785_s3 = inlined_call_operand.vmem [shape: f32[8,128], index: 3, kind: input, shape index: {}]   ;;  %s3786_s4 = inlined_call_operand.vmem [shape: f32[8,128], index: 4, kind: input, shape index: {}]   ;;  %s3787_s5 = inlined_call_operand.vmem [shape: f32[1,64], index: 5, kind: input, shape index: {}]   ;;  %s3788_s6 = inlined_call_operand.hbm [shape: f32[1,64], index: 6, kind: input, shape index: {}]   ;;  %s3789_s7 = inlined_call_operand.hbm [shape: bf16[256,512], index: 7, kind: input, shape index: {}]   ;;  %s3790_s8 = inlined_call_operand.hbm [shape: f32[1,512], index: 8, kind: input, shape index: {}]   ;;  %s3791_s9 = inlined_call_operand.vmem [shape: f32[128,128], index: 9, kind: input, shape index: {}]   ;;  %s3792_s10 = inlined_call_operand.hbm [shape: f32[1,128], index: 10, kind: input, shape index: {}]   ;;  %s3793_s11 = inlined_call_operand.vmem [shape: f32[1,128], index: 11, kind: input, shape index: {}]   ;;  %s3794_s12 = inlined_call_operand.hbm [shape: bf16[128,512], index: 12, kind: input, shape index: {}]   ;;  %s3795_s13 = inlined_call_operand.vmem [shape: f32[1,512], index: 13, kind: input, shape index: {}]   ;;  %s3796_s14 = inlined_call_operand.vmem [shape: bf16[256,64], index: 14, kind: input, shape index: {}]   ;;  %s3797_s15 = inlined_call_operand.vmem [shape: f32[1,64], index: 15, kind: input, shape index: {}]   ;;  %s3798_s16 = inlined_call_operand.hbm [shape: f32[8,8,64], index: 16, kind: output, shape index: {0}]   ;;  %s3799_s17 = inlined_call_operand.hbm [shape: f32[8,128], index: 17, kind: output, shape index: {1}]   ;;  %s3800_s18 = inlined_call_operand.hbm [shape: f32[8,128], index: 18, kind: output, shape index: {2}]   ;;  %s3801_s19 = inlined_call_operand.hbm [shape: f32[8,128], index: 19, kind: output, shape index: {3}]   ;;  %s3802_s20 = inlined_call_operand.hbm [shape: f32[8,128], index: 20, kind: output, shape index: {4}]  }
   0x1   :  { %3819 = sst [smem:[#allocation35_spill]] %s3782_s0 }
   0x2   :  { %3820 = sst [smem:[#allocation36_spill]] %s3783_s1 }
   0x3   :  { %3821 = sst [smem:[#allocation37_spill]] %s3784_s2 }
   0x4   :  { %3822 = sst [smem:[#allocation38_spill]] %s3785_s3 }
   0x5   :  { %3823 = sst [smem:[#allocation39_spill]] %s3786_s4 }
   0x6   :  { %3824 = sst [smem:[#allocation40_spill]] %s3797_s15 }
   0x7   :  { %3825 = sst [smem:[#allocation41_spill]] %s3798_s16 }
   0x8   :  { %3826 = sst [smem:[#allocation42_spill]] %s3800_s18 }
   0x9   :  { %3827 = sst [smem:[#allocation43_spill]] %s3802_s20 }
   0xa   :  { %26 = vsyncpa [#allocation7], 0 }
   0xb   :  { %27 = vsyncpa [#allocation10], 0 }
   0xc   :  { %28 = vsyncpa [#allocation13], 0 }
   0xd   :  { %29 = vsyncpa [#allocation8], 0 }
   0xe   :  { %31 = vsyncpa [#allocation8 + $0x1], 0 }
   0xf   :  { %32 = vsyncpa [#allocation17], 0 }
  0x10   :  { %33 = vsyncpa [#allocation20], 0  ;;  %s3256_s1 = smov 0   ;;  %s3258_s22 = smov 0  }
  0x11   :  { %s3260_s23 = smov 0   ;;  %s3262_s24 = smov 0  }
  0x12 LB: > { %3828 = sst [smem:[#allocation28_spill]] %s3119_s1  ;;  %s3277_s2 = sadd.s32 4294967295, %s3131_s24   ;;  %s3131_s24 = sphi %s3262_s24, %s3882_s24   ;;  %s3127_s23 = sphi %s3260_s23, %s3884_s23   ;;  %s3123_s22 = sphi %s3258_s22, %s3886_s22   ;;  %s3119_s1 = sphi %s3256_s1, %s3885_s1  }
  0x13   : > { %3829 = sst [smem:[#allocation29_spill]] %s3127_s23  ;;  %s2175_s25 = sadd.s32 4294967294, %s3131_s24  }
  0x14   : > { %3830 = sst [smem:[#allocation30_spill]] %s3131_s24  ;;  %s3281_s3 = sadd.s32 1, %s3131_s24  }
  0x15   : > { %3831 = sst [smem:[#allocation31_spill]] %s3281_s3  ;;  %s387_s26 = sadd.s32 1, %s3127_s23 }
  0x16   : > { %s384_s27 = ssub.s32 %s3131_s24, %s3281_s3  ;;  %p397_p0 = scmp.ne.s32.totalorder %s3127_s23, %s3123_s22 }
  0x17   : > { %p385_p1 = scmp.eq.s32.totalorder %s384_s27, 0  ;;  %p3810_p2 = scmp.eq.s32.totalorder %s3277_s2, 7 }
  0x18   : > { %p403_p3 = scmp.ne.s32.totalorder %s3123_s22, %s3119_s1  ;;  %p404_p4 = scmp.eq.s32.totalorder %s2175_s25, 7 }
  0x19   : > { %s3292_s28 = scalar_select %p385_p1, %s3127_s23, %s387_s26  }
  0x1a   : > { %p3296_p5 = por %p3810_p2, %p397_p0  ;;  %p3300_p6 = por %p404_p4, %p403_p3 }
  0x1b   : > { %3832 = sst [smem:[#allocation32_spill]] %s3292_s28  ;;  %p2176_p7 = scmp.ge.s32.totalorder %s3131_s24, 1 }
  0x1c   : > { %s3833_s4 = scalar_select %p3296_p5, 1, 0 }
  0x1d   : > { %s3835_s29 = scalar_select %p3300_p6, 1, 0 }
  0x1e   : > { %3834 = sst [smem:[#allocation33_spill]] %s3833_s4  ;;  %p495_p8 = scmp.lt.s32.totalorder %s3131_s24, 9 }
  0x1f   : > { %3836 = sst [smem:[#allocation34_spill]] %s3835_s29  ;;  %p3811_p10 = scmp.eq.s32.totalorder %s3277_s2, 0 }
  0x20   : > { %p3308_p11 = pnand %p2176_p7, %p495_p8  ;;  %s3133_s0 = smov [#allocation9]  }
  0x21   : > { %s533_s21 = sshll.u32 %s3133_s0, 4  ;;  %s3134_s26 = smov [#allocation12]   ;;  %s3314_s21 = int_to_ptr.vmem [resolvable:$true] %s533_s21 }
  0x22   : > { %s3837_s30 = scalar_select %p3308_p11, 1, 0 }
  0x23   : > { %p2534_p12 = pneg %p3308_p11  ;;  %s561_s27 = sshll.u32 %s3134_s26, 4  ;;  %s3322_s27 = int_to_ptr.vmem [resolvable:$true] %s561_s27 }
  0x24   : > { %s3135_s28 = smov [#allocation6]   ;;  %s2805_s0 = scalar_lea.hbm %s3789_s7, 8192 }
  0x25   : > { %p3318_p13 = pnand %p3811_p10, %p2534_p12  ;;  %s3324_s23 = sshll.u32 %s3135_s28, 4  ;;  %s524_s23 = int_to_ptr.vmem [resolvable:$true] %s3324_s23 }
  0x26   : > { %p2806_p0 = scmp.ne.s32.totalorder %s3789_s7, %s2805_s0  ;;  %p2812_p7 = scmp.lt.u32.totalorder %s2805_s0, %s3789_s7 }
  0x27   : > { %p3334_p1 = pneg %p3318_p13 }
  0x29   : > { %p2808_p3 = pnand %p3334_p1, %p2806_p0 }
  0x2b   : > { %p2809_p4 = pneg %p2808_p3 }
  0x2d   : > { %p2814_p8 = pnand %p2812_p7, %p2809_p4 }
  0x2f   : > { %2817 = shalt.err (!%p2814_p8)
}
  0x30   : > { %s2818_s1 = scalar_lea.vmem %s3314_s21, 8192  ;;  %p2826_p10 = scmp.lt.s32.totalorder %s3314_s21, %s3314_s21 }
  0x31   : > { %p2819_p12 = scmp.ne.s32.totalorder %s3314_s21, %s2818_s1  ;;  %p2827_p6 = scmp.lt.s32.totalorder %s2818_s1, %s2818_s1 }
  0x33   : > { %p2821_p2 = pnand %p2819_p12, %p3334_p1  ;;  %p2828_p0 = por %p2827_p6, %p2826_p10 }
  0x35   : > { %p2822_p9 = pneg %p2821_p2 }
  0x37   : > { %p2829_p3 = pnand %p2828_p0, %p2822_p9 }
  0x39   : > { %2832 = shalt.err (!%p2829_p3)
}
  0x3a   : > { %s3818_s24 = smov 256   ;;  %s3137_s3 = smov 16  }
  0x3b   : > { %2540 = dma.hbm_to_vmem [thread:$0]  (!%p3318_p13), %s3789_s7, 8192, %s3314_s21, [#allocation10], %s3818_s24, %s3818_s24, %s3137_s3  }
  0x3c   : > { %s2833_s1 = scalar_lea.hbm %s3792_s10, 16 }
  0x3d   : > { %p2834_p2 = scmp.ne.s32.totalorder %s3792_s10, %s2833_s1  ;;  %p2840_p10 = scmp.lt.u32.totalorder %s2833_s1, %s3792_s10 }
  0x3f   : > { %p2836_p6 = pnand %p2834_p2, %p3334_p1 }
  0x41   : > { %p2837_p9 = pneg %p2836_p6 }
  0x43   : > { %p2842_p4 = pnand %p2840_p10, %p2837_p9 }
  0x45   : > { %2845 = shalt.err (!%p2842_p4)
}
  0x46   : > { %s2846_s21 = scalar_lea.vmem %s3322_s27, 16  ;;  %s2853_s15 = scalar_lea.vmem %s3322_s27, 32 }
  0x47   : > { %p2847_p7 = scmp.ne.s32.totalorder %s3322_s27, %s2846_s21  ;;  %p2854_p0 = scmp.lt.s32.totalorder %s3322_s27, %s3322_s27 }
  0x48   : > { %p2855_p3 = scmp.lt.s32.totalorder %s2853_s15, %s2846_s21 }
  0x49   : > { %p2849_p8 = pnand %p2847_p7, %p3334_p1 }
  0x4a   : > { %p2856_p2 = por %p2855_p3, %p2854_p0 }
  0x4b   : > { %p2850_p12 = pneg %p2849_p8 }
  0x4d   : > { %p2857_p6 = pnand %p2856_p2, %p2850_p12 }
  0x4f   : > { %2860 = shalt.err (!%p2857_p6)
}
  0x50   : > { %2546 = dma.hbm_to_vmem [thread:$0]  (!%p3318_p13), %s3792_s10, 16, %s3322_s27, [#allocation13]  }
  0x51   : > { %s2861_s0 = scalar_lea.hbm %s3788_s6, 16 }
  0x52   : > { %p2862_p9 = scmp.ne.s32.totalorder %s3788_s6, %s2861_s0  ;;  %p2868_p7 = scmp.lt.u32.totalorder %s2861_s0, %s3788_s6 }
  0x54   : > { %p2864_p10 = pnand %p2862_p9, %p3334_p1 }
  0x56   : > { %p2865_p4 = pneg %p2864_p10 }
  0x58   : > { %p2870_p8 = pnand %p2868_p7, %p2865_p4 }
  0x5a   : > { %2873 = shalt.err (!%p2870_p8)
}
  0x5b   : > { %s2874_s15 = scalar_lea.vmem %s524_s23, 16  ;;  %s2881_s27 = scalar_lea.vmem %s524_s23, 32 }
  0x5c   : > { %p2875_p12 = scmp.ne.s32.totalorder %s524_s23, %s2874_s15  ;;  %p2882_p2 = scmp.lt.s32.totalorder %s524_s23, %s524_s23 }
  0x5d   : > { %p2883_p6 = scmp.lt.s32.totalorder %s2881_s27, %s2874_s15 }
  0x5e   : > { %p2877_p0 = pnand %p2875_p12, %p3334_p1 }
  0x5f   : > { %p2884_p5 = por %p2883_p6, %p2882_p2 }
  0x60   : > { %p2878_p3 = pneg %p2877_p0 }
  0x62   : > { %p2885_p11 = pnand %p2884_p5, %p2878_p3 }
  0x64   : > { %2888 = shalt.err (!%p2885_p11)
}
  0x65   : > { %2537 = dma.hbm_to_vmem [thread:$0]  (!%p3318_p13), %s3788_s6, 16, %s524_s23, [#allocation7]  }
  0x66   : > { %s3138_s4 = smov [#allocation11]   ;;  %s3139_s0 = smov [#allocation14]  }
  0x67   : > { %s547_s29 = sshll.u32 %s3138_s4, 4  ;;  %s574_s26 = sshll.u32 %s3139_s0, 4  ;;  %s548_s29 = int_to_ptr.vmem [resolvable:$true] %s547_s29  ;;  %s575_s26 = int_to_ptr.vmem [resolvable:$true] %s574_s26 }
  0x68   : > { %s2889_s21 = scalar_lea.hbm %s3790_s8, 64 }
  0x69   : > { %p2890_p5 = scmp.ne.s32.totalorder %s3790_s8, %s2889_s21  ;;  %p2896_p10 = scmp.lt.u32.totalorder %s2889_s21, %s3790_s8 }
  0x6b   : > { %p2892_p11 = pnand %p2890_p5, %p3334_p1 }
  0x6d   : > { %p2893_p9 = pneg %p2892_p11 }
  0x6f   : > { %p2898_p4 = pnand %p2896_p10, %p2893_p9 }
  0x71   : > { %2901 = shalt.err (!%p2898_p4)
}
  0x72   : > { %s2902_s23 = scalar_lea.vmem %s548_s29, 64  ;;  %p2910_p0 = scmp.lt.s32.totalorder %s548_s29, %s548_s29 }
  0x73   : > { %p2903_p7 = scmp.ne.s32.totalorder %s548_s29, %s2902_s23  ;;  %p2911_p3 = scmp.lt.s32.totalorder %s2902_s23, %s2902_s23 }
  0x75   : > { %p2905_p8 = pnand %p2903_p7, %p3334_p1  ;;  %p2912_p2 = por %p2911_p3, %p2910_p0 }
  0x77   : > { %p2906_p12 = pneg %p2905_p8 }
  0x79   : > { %p2913_p6 = pnand %p2912_p2, %p2906_p12 }
  0x7b   : > { %2916 = shalt.err (!%p2913_p6)
}
  0x7c   : > { %2543 = dma.hbm_to_vmem [thread:$0]  (!%p3318_p13), %s3790_s8, 64, %s548_s29, [#allocation10]  }
  0x7d   : > { %s2917_s28 = scalar_lea.hbm %s3794_s12, 4096 }
  0x7e   : > { %p2918_p5 = scmp.ne.s32.totalorder %s3794_s12, %s2917_s28  ;;  %p2924_p10 = scmp.lt.u32.totalorder %s2917_s28, %s3794_s12 }
  0x80   : > { %p2920_p11 = pnand %p2918_p5, %p3334_p1 }
  0x82   : > { %p2921_p9 = pneg %p2920_p11 }
  0x84   : > { %p2926_p4 = pnand %p2924_p10, %p2921_p9 }
  0x86   : > { %2929 = shalt.err (!%p2926_p4)
}
  0x87   : > { %s2930_s18 = scalar_lea.vmem %s575_s26, 4096  ;;  %p2938_p0 = scmp.lt.s32.totalorder %s575_s26, %s575_s26 }
  0x88   : > { %p2931_p7 = scmp.ne.s32.totalorder %s575_s26, %s2930_s18  ;;  %p2939_p3 = scmp.lt.s32.totalorder %s2930_s18, %s2930_s18 }
  0x8a   : > { %p2933_p8 = pnand %p2931_p7, %p3334_p1  ;;  %p2940_p2 = por %p2939_p3, %p2938_p0 }
  0x8c   : > { %p2934_p12 = pneg %p2933_p8 }
  0x8e   : > { %p2941_p6 = pnand %p2940_p2, %p2934_p12 }
  0x90   : > { %2944 = shalt.err (!%p2941_p6)
}
  0x91   : > { %s3840_s29 = smov 256   ;;  %p3841_p5 = scmp.ne.s32.totalorder %s3837_s30, 0 }
  0x92   : > { %2549 = dma.hbm_to_vmem [thread:$0]  (!%p3318_p13), %s3794_s12, 4096, %s575_s26, [#allocation13], %s3840_s29, %s3840_s29, %s3137_s3  }
  0x93   : > { %606 = sbr.rel (%p3841_p5) target bundleno = 1712 (0x6b0), region = 84  ;;  %p3842_p1 = scmp.eq.s32.totalorder (!%p3841_p5), %s3277_s2, 0 }
  0x9a   : > { %3094 = dma.done.wait (%p3842_p1), [#allocation7], 16   ;;  %p3843_p11 = pmov %p3842_p1 }
  0x9b   : > { %p3844_p9 = pmov %p3842_p1 }
  0x9c   : > { %3096 = vsyncadd (%p3843_p11), [#allocation7], 4294967280 }
  0x9d   : > { %3098 = dma.done.wait (%p3844_p9), [#allocation10], 8256   ;;  %p3845_p10 = pmov %p3842_p1 }
  0x9e   : > { %p3846_p4 = pmov %p3842_p1 }
  0x9f   : > { %3100 = vsyncadd (%p3845_p10), [#allocation10], 4294959040 }
  0xa0   : > { %3102 = dma.done.wait (%p3846_p4), [#allocation13], 4112   ;;  %p3847_p13 = pmov %p3842_p1 }
  0xa1   : > { %s668_s16 = sand.u32 1, %s3123_s22   ;;  %p679_p7 = scmp.lt.s32.totalorder %s3277_s2, 7 }
  0xa2   : > { %3104 = vsyncadd (%p3847_p13), [#allocation13], 4294963184  ;;  %s3458_s30 = sshll.u32 %s668_s16, 3  ;;  %s3848_s24 = sld [smem:[#allocation35_spill]] }
  0xa3   : > { %s680_s25 = scalar_select %p679_p7, %s3277_s2, 7 }
  0xa4   : > { %s670_s28 = scalar_lea.vmem [#allocation15], %s3458_s30  ;;  %p3849_p8 = scmp.ne.s32.totalorder %s3277_s2, 0 }
  0xa5   : > { %s2190_s3 = sshll.u32 %s680_s25, 3  ;;  %s3850_s15 = sld [smem:[#allocation36_spill]] (!%p3849_p8)  ;;  %v3140_v3 = vmov (!%p3849_p8), 0.0  }
  0xa6   : > { %687 = sbr.rel (%p3849_p8) target bundleno = 176 (0xb0), region = 108  ;;  %s3851_s29 = sld [smem:[#allocation37_spill]] (!%p3849_p8)  ;;  %688 = vst [vmem:[#allocation2] sm:$0xff] (!%p3849_p8), %v3140_v3 }
  0xa7   : > { %s3852_s25 = sld [smem:[#allocation38_spill]] (!%p3849_p8)  ;;  %s3853_s4 = sld [smem:[#allocation39_spill]] (!%p3849_p8) }
  0xa8   : > { %s3464_s0 = scalar_lea.vmem %s3848_s24, %s2190_s3 }
  0xab   : > { %v690_v0 = vld [vmem:[%s3850_s15] sm:$0xff] (!%p3849_p8) }
  0xac   : > { %v692_v1 = vld [vmem:[%s3851_s29] sm:$0xff] (!%p3849_p8)  ;;  %691 = vst [vmem:[#allocation2 + $0x8] sm:$0xff] (!%p3849_p8), %v690_v0 }
  0xad   : > { %v694_v2 = vld [vmem:[%s3852_s25] sm:$0xff]  ;;  %693 = vst [vmem:[#allocation3] sm:$0xff] %v692_v1 }
  0xae   : > { %695 = vst [vmem:[#allocation4] sm:$0xff] %v694_v2  ;;  %v696_v4 = vld [vmem:[%s3853_s4] sm:$0xff] }
  0xaf   : > { %697 = vst [vmem:[#allocation5] sm:$0xff] %v696_v4 }
  0xb0 PF: > { %v3482_v5 = vld [vmem:[%s3464_s0] sm:$0xff]  ;;  %vm699_vm0 = vcmask 523264   ;;  %v2626_v9 = vld [vmem:[#allocation9] ss:$16 sps:$4 sm:$0xff]   ;;  %v771_v48 = vld [vmem:[#allocation9 + $0x108] sm:$0xff]  ;;  %vm3142_vm1 = vmmov 0  }
  0xb1   : > { %v700_v6 = vsel %vm699_vm0, %v3482_v5, 0.0  ;;  %v2622_v7 = vld [vmem:[#allocation9 + $0x4] ss:$16 sps:$4 sm:$0xff]   ;;  %v2624_v8 = vld [vmem:[#allocation9 + $0xc] ss:$16 sps:$4 sm:$0xff]   ;;  %s3146_s18 = smov [#allocation16]  }
  0xb2   : > { %701 = vadd.xlane.f32.xlu0 %v700_v6  ;;  %v2627_v10 = vld [vmem:[#allocation9 + $0x8] ss:$16 sps:$4 sm:$0xff]   ;;  %v2628_v11 = vld [vmem:[#allocation9 + $0x24] ss:$16 sps:$4 sm:$0xff]   ;;  %v2630_v12 = vld [vmem:[#allocation9 + $0x2c] ss:$16 sps:$4 sm:$0xff]   ;;  %1144 = vmatprep.subr.bf16.mxu0 %v2622_v7 }
  0xb3   : > { %1185 = vmatprep.subr.bf16.mxu1 %v2624_v8  ;;  %1145 = vmatpush1.bf16.msra.mxu0 %v2626_v9  ;;  %v2632_v13 = vld [vmem:[#allocation9 + $0x20] ss:$16 sps:$4 sm:$0xff]   ;;  %v2633_v14 = vld [vmem:[#allocation9 + $0x28] ss:$16 sps:$4 sm:$0xff]   ;;  %v2634_v15 = vld [vmem:[#allocation9 + $0x44] ss:$16 sps:$4 sm:$0xff]  }
  0xb4   : > { %1186 = vmatpush1.bf16.msra.mxu1 %v2627_v10  ;;  %1146 = vmatprep.subr.bf16.mxu0 %v2628_v11  ;;  %v2636_v16 = vld [vmem:[#allocation9 + $0x4c] ss:$16 sps:$4 sm:$0xff]   ;;  %v2638_v17 = vld [vmem:[#allocation9 + $0x40] ss:$16 sps:$4 sm:$0xff]   ;;  %v2639_v18 = vld [vmem:[#allocation9 + $0x48] ss:$16 sps:$4 sm:$0xff]  }
  0xb5   : > { %1187 = vmatprep.subr.bf16.mxu1 %v2630_v12  ;;  %v2640_v19 = vld [vmem:[#allocation9 + $0x64] ss:$16 sps:$4 sm:$0xff]   ;;  %v2642_v20 = vld [vmem:[#allocation9 + $0x6c] ss:$16 sps:$4 sm:$0xff]   ;;  %v2644_v21 = vld [vmem:[#allocation9 + $0x60] ss:$16 sps:$4 sm:$0xff]  }
  0xb6   : > { %v2645_v22 = vld [vmem:[#allocation9 + $0x68] ss:$16 sps:$4 sm:$0xff]   ;;  %v2646_v23 = vld [vmem:[#allocation9 + $0x84] ss:$16 sps:$4 sm:$0xff]   ;;  %v2648_v24 = vld [vmem:[#allocation9 + $0x8c] ss:$16 sps:$4 sm:$0xff]  }
  0xb7   : > { %1147 = vmatpush1.bf16.msra.mxu0 %v2632_v13  ;;  %v2650_v25 = vld [vmem:[#allocation9 + $0x80] ss:$16 sps:$4 sm:$0xff]   ;;  %v2651_v26 = vld [vmem:[#allocation9 + $0x88] ss:$16 sps:$4 sm:$0xff]   ;;  %v2652_v27 = vld [vmem:[#allocation9 + $0xa4] ss:$16 sps:$4 sm:$0xff]  }
  0xb8   : > { %1188 = vmatpush1.bf16.msra.mxu1 %v2633_v14  ;;  %1148 = vmatprep.subr.bf16.mxu0 %v2634_v15  ;;  %v2654_v28 = vld [vmem:[#allocation9 + $0xac] ss:$16 sps:$4 sm:$0xff]   ;;  %v2656_v29 = vld [vmem:[#allocation9 + $0xa0] ss:$16 sps:$4 sm:$0xff]   ;;  %v2657_v30 = vld [vmem:[#allocation9 + $0xa8] ss:$16 sps:$4 sm:$0xff]  }
  0xb9   : > { %1189 = vmatprep.subr.bf16.mxu1 %v2636_v16  ;;  %v2658_v31 = vld [vmem:[#allocation9 + $0xc4] ss:$16 sps:$4 sm:$0xff]   ;;  %v2660_v32 = vld [vmem:[#allocation9 + $0xcc] ss:$16 sps:$4 sm:$0xff]   ;;  %v2662_v33 = vld [vmem:[#allocation9 + $0xc0] ss:$16 sps:$4 sm:$0xff]  }
  0xba   : > { %v2663_v34 = vld [vmem:[#allocation9 + $0xc8] ss:$16 sps:$4 sm:$0xff]   ;;  %v2664_v35 = vld [vmem:[#allocation9 + $0xe4] ss:$16 sps:$4 sm:$0xff]   ;;  %v2666_v36 = vld [vmem:[#allocation9 + $0xec] ss:$16 sps:$4 sm:$0xff]  }
  0xbb   : > { %1149 = vmatpush1.bf16.msra.mxu0 %v2638_v17  ;;  %v2668_v37 = vld [vmem:[#allocation9 + $0xe0] ss:$16 sps:$4 sm:$0xff]   ;;  %v2669_v38 = vld [vmem:[#allocation9 + $0xe8] ss:$16 sps:$4 sm:$0xff]   ;;  %v2670_v39 = vld [vmem:[#allocation9 + $0x104] ss:$16 sps:$4 sm:$0xff]  }
  0xbc   : > { %1190 = vmatpush1.bf16.msra.mxu1 %v2639_v18  ;;  %1150 = vmatprep.subr.bf16.mxu0 %v2640_v19  ;;  %v2672_v40 = vld [vmem:[#allocation9 + $0x10c] ss:$16 sps:$4 sm:$0xff]   ;;  %v770_v46 = vld [vmem:[#allocation9 + $0x100] sm:$0xff]  ;;  %v772_v47 = vld [vmem:[#allocation9 + $0x110] sm:$0xff]  ;;  %s1991_s29 = sshll.u32 %s3146_s18, 4  ;;  %s3147_s23 = smov [#allocation19]   ;;  %s1992_s29 = int_to_ptr.vmem [resolvable:$true] %s1991_s29 }
  0xbd   : > { %1191 = vmatprep.subr.bf16.mxu1 %v2642_v20  ;;  %v773_v49 = vld [vmem:[#allocation9 + $0x118] sm:$0xff]  ;;  %v2226_v50 = vcombine.low %v770_v46, %v772_v47  ;;  %v2674_v52 = vld [vmem:[#allocation9 + $0x124] ss:$16 sps:$4 sm:$0xff]   ;;  %v2678_v54 = vld [vmem:[#allocation9 + $0x120] ss:$16 sps:$4 sm:$0xff]   ;;  %s2013_s20 = sshll.u32 %s3147_s23, 4  ;;  %p2952_p6 = scmp.lt.s32.totalorder %s1992_s29, %s1992_s29  ;;  %s3638_s20 = int_to_ptr.vmem [resolvable:$true] %s2013_s20 }
  0xbe   : > { %v2228_v51 = vcombine.low %v771_v48, %v773_v49  ;;  %v2676_v53 = vld [vmem:[#allocation9 + $0x12c] ss:$16 sps:$4 sm:$0xff]   ;;  %v2679_v55 = vld [vmem:[#allocation9 + $0x128] ss:$16 sps:$4 sm:$0xff]   ;;  %v2680_v56 = vld [vmem:[#allocation9 + $0x144] ss:$16 sps:$4 sm:$0xff]  }
  0xbf   : > { %1151 = vmatpush1.bf16.msra.mxu0 %v2644_v21  ;;  %v2682_v57 = vld [vmem:[#allocation9 + $0x14c] ss:$16 sps:$4 sm:$0xff]   ;;  %v2684_v58 = vld [vmem:[#allocation9 + $0x140] ss:$16 sps:$4 sm:$0xff]   ;;  %v2685_v59 = vld [vmem:[#allocation9 + $0x148] ss:$16 sps:$4 sm:$0xff]  }
  0xc0   : > { %1192 = vmatpush1.bf16.msra.mxu1 %v2645_v22  ;;  %1152 = vmatprep.subr.bf16.mxu0 %v2646_v23  ;;  %v2686_v60 = vld [vmem:[#allocation9 + $0x164] ss:$16 sps:$4 sm:$0xff]   ;;  %v2688_v61 = vld [vmem:[#allocation9 + $0x16c] ss:$16 sps:$4 sm:$0xff]   ;;  %v2690_v62 = vld [vmem:[#allocation9 + $0x160] ss:$16 sps:$4 sm:$0xff]  }
  0xc1   : > { %1193 = vmatprep.subr.bf16.mxu1 %v2648_v24  ;;  %v2691_v63 = vld [vmem:[#allocation9 + $0x168] ss:$16 sps:$4 sm:$0xff]   ;;  %v2692_v0 = vld [vmem:[#allocation9 + $0x184] ss:$16 sps:$4 sm:$0xff]   ;;  %v2694_v1 = vld [vmem:[#allocation9 + $0x18c] ss:$16 sps:$4 sm:$0xff]  }
  0xc2   : > { %v2696_v2 = vld [vmem:[#allocation9 + $0x180] ss:$16 sps:$4 sm:$0xff]   ;;  %v2697_v3 = vld [vmem:[#allocation9 + $0x188] ss:$16 sps:$4 sm:$0xff]   ;;  %v2698_v4 = vld [vmem:[#allocation9 + $0x1a4] ss:$16 sps:$4 sm:$0xff]  }
  0xc3   : > { %1153 = vmatpush1.bf16.msra.mxu0 %v2650_v25  ;;  %v2702_v6 = vld [vmem:[#allocation9 + $0x1a0] ss:$16 sps:$4 sm:$0xff]   ;;  %v2703_v7 = vld [vmem:[#allocation9 + $0x1a8] ss:$16 sps:$4 sm:$0xff]   ;;  %v2704_v8 = vld [vmem:[#allocation9 + $0x1c4] ss:$16 sps:$4 sm:$0xff]  }
  0xc4   : > { %1194 = vmatpush1.bf16.msra.mxu1 %v2651_v26  ;;  %1154 = vmatprep.subr.bf16.mxu0 %v2652_v27  ;;  %v2706_v9 = vld [vmem:[#allocation9 + $0x1cc] ss:$16 sps:$4 sm:$0xff]   ;;  %v2708_v10 = vld [vmem:[#allocation9 + $0x1c0] ss:$16 sps:$4 sm:$0xff]   ;;  %v2709_v11 = vld [vmem:[#allocation9 + $0x1c8] ss:$16 sps:$4 sm:$0xff]  }
  0xc5   : > { %1195 = vmatprep.subr.bf16.mxu1 %v2654_v28  ;;  %v2710_v12 = vld [vmem:[#allocation9 + $0x1e4] ss:$16 sps:$4 sm:$0xff]   ;;  %v2712_v13 = vld [vmem:[#allocation9 + $0x1ec] ss:$16 sps:$4 sm:$0xff]   ;;  %v2714_v15 = vld [vmem:[#allocation9 + $0x1e0] ss:$16 sps:$4 sm:$0xff]  }
  0xc6   : > { %v732_v14 = vld [vmem:[#allocation2 + $0x8] sm:$0xff]  ;;  %v2715_v16 = vld [vmem:[#allocation9 + $0x1e8] ss:$16 sps:$4 sm:$0xff]   ;;  %v2192_v22 = vld [vmem:[%s3787_s5] ss:$0 sm:$0xff]  ;;  %s2945_s25 = scalar_lea.vmem %s1992_s29, 128 }
  0xc7   : > { %1155 = vmatpush1.bf16.msra.mxu0 %v2656_v29  ;;  %v737_v17 = vpack.c.bf16 %v732_v14, %v732_v14  ;;  %v2193_v24 = vld [vmem:[#allocation6] ss:$0 sm:$0xff]  ;;  %v1250_v29 = vld [vmem:[%s3791_s9] sm:$0xff]  ;;  %v1261_v46 = vld [vmem:[%s3791_s9 + $0x58] sm:$0xff]  ;;  %p2946_p12 = scmp.ne.s32.totalorder %s1992_s29, %s2945_s25  ;;  %p3854_p0 = scmp.eq.s32.totalorder %s3277_s2, 7 }
  0xc8   : > { %1196 = vmatpush1.bf16.msra.mxu1 %v2657_v30  ;;  %1156 = vmatprep.subr.bf16.mxu0 %v2658_v31  ;;  %v1251_v30 = vld [vmem:[%s3791_s9 + $0x8] sm:$0xff]  ;;  %v1262_v48 = vld [vmem:[%s3791_s9 + $0x60] sm:$0xff]  ;;  %p2953_p5 = scmp.lt.s32.totalorder %s2945_s25, %s2945_s25 }
  0xc9   : > { %1197 = vmatprep.subr.bf16.mxu1 %v2660_v32  ;;  %1176 = vmatprep.mubr.bf16.mxu0 %v737_v17  ;;  %v2449_v31 = vpack.c.bf16 %v1251_v30, %v1250_v29  ;;  %v3141_v32 = vmov 0.0|0.0   ;;  %v1263_v49 = vld [vmem:[%s3791_s9 + $0x68] sm:$0xff]  ;;  %p2947_p3 = pnand %p2946_p12, %p3854_p0 }
  0xca   : > { %1217 = vmatprep.mubr.bf16.mxu1 %v737_v17  ;;  %p2954_p1 = por %p2953_p5, %p2952_p6 }
  0xcb   : > { %1157 = vmatpush1.bf16.msra.mxu0 %v2662_v33  ;;  %v1252_v33 = vld [vmem:[%s3791_s9 + $0x10] sm:$0xff]  ;;  %p2948_p2 = pneg %p2947_p3 }
  0xcc   : > { %1198 = vmatpush1.bf16.msra.mxu1 %v2663_v34  ;;  %1158 = vmatprep.subr.bf16.mxu0 %v2664_v35  ;;  %v1253_v34 = vld [vmem:[%s3791_s9 + $0x18] sm:$0xff] }
  0xcd   : > { %1199 = vmatprep.subr.bf16.mxu1 %v2666_v36  ;;  %v2452_v35 = vpack.c.bf16 %v1253_v34, %v1252_v33  ;;  %v1254_v36 = vld [vmem:[%s3791_s9 + $0x20] sm:$0xff]  ;;  %p2955_p11 = pnand %p2954_p1, %p2948_p2 }
  0xcf   : > { %1159 = vmatpush1.bf16.msra.mxu0 %v2668_v37  ;;  %v1255_v37 = vld [vmem:[%s3791_s9 + $0x28] sm:$0xff] }
  0xd0   : > { %1200 = vmatpush1.bf16.msra.mxu1 %v2669_v38  ;;  %1160 = vmatprep.subr.bf16.mxu0 %v2670_v39  ;;  %v2455_v38 = vpack.c.bf16 %v1255_v37, %v1254_v36  ;;  %v1256_v39 = vld [vmem:[%s3791_s9 + $0x30] sm:$0xff] }
  0xd1   : > { %1201 = vmatprep.subr.bf16.mxu1 %v2672_v40  ;;  %v1257_v40 = vld [vmem:[%s3791_s9 + $0x38] sm:$0xff] }
  0xd3   : > { %1161 = vmatpush1.bf16.msra.mxu0 %v2226_v50  ;;  %v3143_v50 = vmov 0.0  }
  0xd4   : > { %1202 = vmatpush1.bf16.msra.mxu1 %v2228_v51  ;;  %1162 = vmatprep.subr.bf16.mxu0 %v2674_v52  ;;  %v2467_v51 = vpack.c.bf16 %v1263_v49, %v1262_v48  ;;  %v1264_v52 = vld [vmem:[%s3791_s9 + $0x70] sm:$0xff]  ;;  %v2719_v49 = vld [vmem:[#allocation14 + $0x8] ss:$16 sps:$4 sm:$0xff]  }
  0xd5   : > { %1203 = vmatprep.subr.bf16.mxu1 %v2676_v53  ;;  %v1265_v53 = vld [vmem:[%s3791_s9 + $0x78] sm:$0xff] }
  0xd7   : > { %1163 = vmatpush1.bf16.msra.mxu0 %v2678_v54  ;;  %v2470_v54 = vpack.c.bf16 %v1265_v53, %v1264_v52  ;;  %v2725_v52 = vld [vmem:[#allocation14 + $0x28] ss:$16 sps:$4 sm:$0xff]   ;;  %v2733_v53 = vld [vmem:[#allocation14 + $0x4c] ss:$16 sps:$4 sm:$0xff]  }
  0xd8   : > { %1204 = vmatpush1.bf16.msra.mxu1 %v2679_v55  ;;  %1164 = vmatprep.subr.bf16.mxu0 %v2680_v56  ;;  %v804_v55 = vlaneseq }
  0xd9   : > { %1205 = vmatprep.subr.bf16.mxu1 %v2682_v57 }
  0xda   : > { %v3545_v56 = vshrl.u32 %v804_v55, 7  ;;  %v2736_v55 = vld [vmem:[#allocation14 + $0x64] ss:$16 sps:$4 sm:$0xff]  }
  0xdb   : > { %1165 = vmatpush1.bf16.msra.mxu0 %v2684_v58  ;;  %v802_v58 = vld [vmem:[#allocation11] sm:$0xf] }
  0xdc   : > { %1206 = vmatpush1.bf16.msra.mxu1 %v2685_v59  ;;  %1166 = vmatprep.subr.bf16.mxu0 %v2686_v60  ;;  %v810_v57 = vsub.s32 1, %v3545_v56  ;;  %v806_v59 = vsub.s32 0, %v3545_v56  ;;  %v818_v60 = vsub.s32 3, %v3545_v56 }
  0xdd   : > { %1207 = vmatprep.subr.bf16.mxu1 %v2688_v61 }
  0xde   : > { %v811_v61 = vrot.slane %v802_v58, %v810_v57 }
  0xdf   : > { %1167 = vmatpush1.bf16.msra.mxu0 %v2690_v62  ;;  %v814_v62 = vsub.s32 2, %v3545_v56 }
  0xe0   : > { %1208 = vmatpush1.bf16.msra.mxu1 %v2691_v63  ;;  %1168 = vmatprep.subr.bf16.mxu0 %v2692_v0  ;;  %v807_v63 = vrot.slane %v802_v58, %v806_v59 }
  0xe1   : > { %1209 = vmatprep.subr.bf16.mxu1 %v2694_v1 }
  0xe3   : > { %1169 = vmatpush1.bf16.msra.mxu0 %v2696_v2  ;;  %v734_v2 = vld [vmem:[#allocation4] sm:$0xff] }
  0xe4   : > { %1210 = vmatpush1.bf16.msra.mxu1 %v2697_v3  ;;  %1170 = vmatprep.subr.bf16.mxu0 %v2698_v4  ;;  %v819_v4 = vrot.slane %v802_v58, %v818_v60 }
  0xe7   : > { %1171 = vmatpush1.bf16.msra.mxu0 %v2702_v6 }
  0xe8   : > { %1172 = vmatprep.subr.bf16.mxu0 %v2704_v8 }
  0xeb   : > { %1173 = vmatpush1.bf16.msra.mxu0 %v2708_v10 }
  0xec   : > { %1174 = vmatprep.subr.bf16.mxu0 %v2710_v12 }
  0xef   : > { %1175 = vmatpush1.bf16.msra.mxu0 %v2714_v15 }
  0xf0   : > { %2448 = vmatprep.subr.bf16.mxu0 %v3141_v32 }
 0x13f   : > { %v702_v41 = vpop.xlane.xlu0 %701 }
 0x140   : > { %v704_v42 = vmul.f32 0.015625, %v702_v41  ;;  %v2458_v41 = vpack.c.bf16 %v1257_v40, %v1256_v39  ;;  %v2716_v39 = vld [vmem:[#allocation14] ss:$16 sps:$4 sm:$0xff]   ;;  %v2718_v40 = vld [vmem:[#allocation14 + $0x4] ss:$16 sps:$4 sm:$0xff]  }
 0x142   : > { %v3487_v43 = vsub.f32 %v3482_v5, %v704_v42  ;;  %v2700_v5 = vld [vmem:[#allocation9 + $0x1ac] ss:$16 sps:$4 sm:$0xff]  }
 0x143   : > { %1211 = vmatprep.subr.bf16.mxu1 %v2700_v5  ;;  %v1258_v42 = vld [vmem:[%s3791_s9 + $0x40] sm:$0xff] }
 0x144   : > { %v706_v44 = vmul.f32 %v3487_v43, %v3487_v43  ;;  %1212 = vmatpush1.bf16.msra.mxu1 %v2703_v7 }
 0x145   : > { %1213 = vmatprep.subr.bf16.mxu1 %v2706_v9  ;;  %v815_v9 = vrot.slane %v802_v58, %v814_v62  ;;  %v2739_v58 = vld [vmem:[#allocation14 + $0x6c] ss:$16 sps:$4 sm:$0xff]  }
 0x146   : > { %v707_v45 = vsel %vm699_vm0, %v706_v44, 0.0 }
 0x147   : > { %708 = vadd.xlane.f32.xlu0 %v707_v45  ;;  %v1260_v45 = vld [vmem:[%s3791_s9 + $0x50] sm:$0xff] }
 0x148   : > { %1214 = vmatpush1.bf16.msra.mxu1 %v2709_v11  ;;  %v2464_v47 = vpack.c.bf16 %v1261_v46, %v1260_v45  ;;  %v2728_v45 = vld [vmem:[#allocation14 + $0x40] ss:$16 sps:$4 sm:$0xff]  }
 0x149   : > { %1215 = vmatprep.subr.bf16.mxu1 %v2712_v13 }
 0x14c   : > { %1216 = vmatpush1.bf16.msra.mxu1 %v2715_v16 }
 0x14d   : > { %2472 = vmatprep.subr.bf16.mxu1 %v3141_v32 }
 0x1d4   : > { %v709_v18 = vpop.xlane.xlu0 %708 }
 0x1d5   : > { %v710_v19 = vmul.f32 0.015625, %v709_v18 }
 0x1d7   : > { %v711_v20 = vadd.f32 1e-05, %v710_v19 }
 0x1d9   : > { %2780 = vrsqrt.f32 %v711_v20 }
 0x1e3   : > { %v2781_v21 = vpop.eup %2780 }
 0x1e4   : > { %v713_v23 = vmul.f32 %v2781_v21, %v3487_v43  ;;  %v1259_v43 = vld [vmem:[%s3791_s9 + $0x48] sm:$0xff] }
 0x1e5   : > { %v2461_v44 = vpack.c.bf16 %v1259_v43, %v1258_v42  ;;  %v2724_v42 = vld [vmem:[#allocation14 + $0x24] ss:$16 sps:$4 sm:$0xff]   ;;  %v2722_v43 = vld [vmem:[#allocation14 + $0x20] ss:$16 sps:$4 sm:$0xff]  }
 0x1e6   : > { %v721_v25 = vmul.f32 %v2192_v22, %v713_v23 }
 0x1e8   : > { %v729_v26 = vadd.f32 %v2193_v24, %v721_v25  ;;  %v735_v25 = vld [vmem:[#allocation5] sm:$0xff] }
 0x1ea   : > { %730 = vst.msk [vmem:[#allocation2] sm:$0xff] %vm699_vm0, %v729_v26  ;;  %v733_v26 = vld [vmem:[#allocation3] sm:$0xff] }
 0x1f1   : > { %v731_v27 = vld [vmem:[#allocation2] sm:$0xff] }
 0x1f2   : > { %v736_v28 = vpack.c.bf16 %v731_v27, %v731_v27 }
 0x1f4   : > { %1177 = vmatmul.mubr.bf16.vlgmr.msra.gmra.mrb[0].mxu0 %v736_v28  ;;  %1218 = vmatmul.mubr.bf16.vlgmr.msra.gmra.mrb[0].mxu1 %v736_v28 }
 0x1f5   : > { %2450 = vmatpush3.bf16.msra.mxu0 %v2449_v31  ;;  %2474 = vmatpush3.bf16.msra.mxu1 %v2449_v31 }
 0x1f6   : > { %2451 = vmatprep.subr.bf16.mxu0 %v3141_v32  ;;  %2475 = vmatprep.subr.bf16.mxu1 %v3141_v32 }
 0x1f7   : > { %2410 = vmatprep.mubr.msk.f32.mxu0 %vm3142_vm1, %v3143_v50  ;;  %2445 = vmatprep.mubr.msk.f32.mxu1 %vm3142_vm1, %v3143_v50 }
 0x1f9   : > { %2453 = vmatpush3.bf16.msra.mxu0 %v2452_v35  ;;  %2477 = vmatpush3.bf16.msra.mxu1 %v2452_v35 }
 0x1fa   : > { %2454 = vmatprep.subr.bf16.mxu0 %v3141_v32  ;;  %2478 = vmatprep.subr.bf16.mxu1 %v3141_v32 }
 0x1fd   : > { %2456 = vmatpush3.bf16.msra.mxu0 %v2455_v38  ;;  %2480 = vmatpush3.bf16.msra.mxu1 %v2455_v38 }
 0x1fe   : > { %2457 = vmatprep.subr.bf16.mxu0 %v3141_v32  ;;  %2481 = vmatprep.subr.bf16.mxu1 %v3141_v32 }
 0x201   : > { %2459 = vmatpush3.bf16.msra.mxu0 %v2458_v41  ;;  %2483 = vmatpush3.bf16.msra.mxu1 %v2458_v41  ;;  %v2721_v41 = vld [vmem:[#allocation14 + $0xc] ss:$16 sps:$4 sm:$0xff]  }
 0x202   : > { %2460 = vmatprep.subr.bf16.mxu0 %v3141_v32  ;;  %2484 = vmatprep.subr.bf16.mxu1 %v3141_v32 }
 0x205   : > { %2462 = vmatpush3.bf16.msra.mxu0 %v2461_v44  ;;  %2486 = vmatpush3.bf16.msra.mxu1 %v2461_v44  ;;  %v2730_v44 = vld [vmem:[#allocation14 + $0x44] ss:$16 sps:$4 sm:$0xff]  }
 0x206   : > { %2463 = vmatprep.subr.bf16.mxu0 %v3141_v32  ;;  %2487 = vmatprep.subr.bf16.mxu1 %v3141_v32 }
 0x209   : > { %2465 = vmatpush3.bf16.msra.mxu0 %v2464_v47  ;;  %2489 = vmatpush3.bf16.msra.mxu1 %v2464_v47 }
 0x20a   : > { %2466 = vmatprep.subr.bf16.mxu0 %v3141_v32  ;;  %2490 = vmatprep.subr.bf16.mxu1 %v3141_v32 }
 0x20d   : > { %2468 = vmatpush3.bf16.msra.mxu0 %v2467_v51  ;;  %2492 = vmatpush3.bf16.msra.mxu1 %v2467_v51  ;;  %v2727_v51 = vld [vmem:[#allocation14 + $0x2c] ss:$16 sps:$4 sm:$0xff]  }
 0x20e   : > { %2469 = vmatprep.subr.bf16.mxu0 %v3141_v32  ;;  %2493 = vmatprep.subr.bf16.mxu1 %v3141_v32 }
 0x211   : > { %2471 = vmatpush3.bf16.msra.mxu0 %v2470_v54  ;;  %2495 = vmatpush3.bf16.msra.mxu1 %v2470_v54  ;;  %v2731_v54 = vld [vmem:[#allocation14 + $0x48] ss:$16 sps:$4 sm:$0xff]  }
 0x212   : > { %1641 = vmatprep.subr.bf16.mxu0 %v2718_v40  ;;  %1682 = vmatprep.subr.bf16.mxu1 %v2721_v41  ;;  %v2777_v40 = vld [vmem:[%s3796_s14 + $0x30] sm:$0xff]   ;;  %v2778_v41 = vld [vmem:[%s3796_s14 + $0x78] sm:$0xff]  }
 0x2c7   : > { %v1178_v0 = vpop.f32.mrb[0].mxu0  ;;  %v1219_v1 = vpop.f32.mrb[0].mxu1 }
 0x2c8   : > { %v1180_v3 = vpop.f32.mrb[1].mxu0  ;;  %v1221_v5 = vpop.f32.mrb[1].mxu1  ;;  %v1179_v12 = vadd.f32 %v1178_v0, %v807_v63  ;;  %v1220_v16 = vadd.f32 %v1219_v1, %v815_v9  ;;  %v2737_v63 = vld [vmem:[#allocation14 + $0x68] ss:$16 sps:$4 sm:$0xff]   ;;  %v2740_v0 = vld [vmem:[#allocation14 + $0x80] ss:$16 sps:$4 sm:$0xff]  }
 0x2c9   : > { %v1181_v6 = vadd.f32 %v1180_v3, %v811_v61  ;;  %v1182_v7 = vpop.f32.mrb[2].mxu0  ;;  %v1223_v8 = vpop.f32.mrb[2].mxu1  ;;  %v1222_v14 = vadd.f32 %v1221_v5, %v819_v4  ;;  %v2734_v61 = vld [vmem:[#allocation14 + $0x60] ss:$16 sps:$4 sm:$0xff]   ;;  %v2742_v1 = vld [vmem:[#allocation14 + $0x84] ss:$16 sps:$4 sm:$0xff]  }
 0x2ca   : > { %v1183_v10 = vpop.f32.mrb[3].mxu0  ;;  %v1224_v11 = vpop.f32.mrb[3].mxu1  ;;  %2782 = vtanh.f32 %v1220_v16  ;;  %v2745_v3 = vld [vmem:[#allocation14 + $0x8c] ss:$16 sps:$4 sm:$0xff]   ;;  %v2748_v4 = vld [vmem:[#allocation14 + $0xa4] ss:$16 sps:$4 sm:$0xff]  }
 0x2cb   : > { %v1226_v13 = vadd.f32 %v1181_v6, %v734_v2  ;;  %v2258_v19 = vmul.f32 -1.442695, %v1222_v14  ;;  %v2751_v5 = vld [vmem:[#allocation14 + $0xac] ss:$16 sps:$4 sm:$0xff]   ;;  %v2749_v7 = vld [vmem:[#allocation14 + $0xa8] ss:$16 sps:$4 sm:$0xff]  }
 0x2cc   : > { %v2754_v8 = vld [vmem:[#allocation14 + $0xc4] ss:$16 sps:$4 sm:$0xff]   ;;  %v2757_v9 = vld [vmem:[#allocation14 + $0xcc] ss:$16 sps:$4 sm:$0xff]   ;;  %v3144_v10 = vmov 0  }
 0x2cd   : > { %v1227_v15 = vmax.f32 %v1226_v13, %v1179_v12  ;;  %v2752_v11 = vld [vmem:[#allocation14 + $0xc0] ss:$16 sps:$4 sm:$0xff]   ;;  %v2760_v13 = vld [vmem:[#allocation14 + $0xe4] ss:$16 sps:$4 sm:$0xff]   ;;  %v2763_v14 = vld [vmem:[#allocation14 + $0xec] ss:$16 sps:$4 sm:$0xff]  }
 0x2ce   : > { %v2761_v16 = vld [vmem:[#allocation14 + $0xe8] ss:$16 sps:$4 sm:$0xff]  }
 0x2cf   : > { %v1228_v17 = vsub.f32 %v1179_v12, %v1227_v15  ;;  %v1231_v18 = vsub.f32 %v1181_v6, %v1227_v15  ;;  %1964 = vst [vmem:[#allocation4] sm:$0xff] %v1227_v15  ;;  %1960 = vst [vmem:[#allocation19] sm:$0xff] %v1227_v15  ;;  %v2746_v6 = vld [vmem:[#allocation14 + $0xa0] ss:$16 sps:$4 sm:$0xff]   ;;  %v2755_v12 = vld [vmem:[#allocation14 + $0xc8] ss:$16 sps:$4 sm:$0xff]  }
 0x2d0   : > { %v2758_v15 = vld [vmem:[#allocation14 + $0xe0] ss:$16 sps:$4 sm:$0xff]  }
 0x2d1   : > { %v1229_v20 = vmul.f32 1.442695, %v1228_v17  ;;  %v1232_v21 = vadd.f32 %v1231_v18, %v734_v2  ;;  %v2743_v2 = vld [vmem:[#allocation14 + $0x88] ss:$16 sps:$4 sm:$0xff]  }
 0x2d3   : > { %2784 = vpow2.f32 %v1229_v20  ;;  %v1233_v22 = vmul.f32 1.442695, %v1232_v21  ;;  %v2259_v21 = vld [vmem:[#allocation12] ss:$0 sm:$0xff] }
 0x2d4   : > { %2786 = vpow2.f32 %v2258_v19  ;;  %v2783_v23 = vpop.eup %2782 }
 0x2d5   : > { %2788 = vpow2.f32 %v1233_v22 }
 0x2dd   : > { %v2785_v24 = vpop.eup %2784 }
 0x2de   : > { %v2787_v27 = vpop.eup %2786  ;;  %v1243_v28 = vmul.f32 %v2785_v24, %v2783_v23  ;;  %v2260_v23 = vld [vmem:[%s3793_s11] ss:$0 sm:$0xff] }
 0x2df   : > { %v2789_v29 = vpop.eup %2788  ;;  %v1239_v33 = vadd.f32 1.0, %v2787_v27  ;;  %v2764_v27 = vld [vmem:[%s3796_s14 + $0x40] sm:$0xff]  }
 0x2e0   : > { %v1245_v30 = vmul.f32 %v2789_v29, %v735_v25  ;;  %v1242_v31 = vmul.f32 %v2789_v29, %v733_v26  ;;  %v2766_v29 = vld [vmem:[%s3796_s14 + $0x48] sm:$0xff]  }
 0x2e2   : > { %v1246_v32 = vadd.f32 %v2785_v24, %v1245_v30  ;;  %v1244_v34 = vadd.f32 %v1243_v28, %v1242_v31  ;;  %v2765_v28 = vld [vmem:[%s3796_s14] sm:$0xff]   ;;  %v2767_v30 = vld [vmem:[%s3796_s14 + $0x8] sm:$0xff]   ;;  %v2768_v31 = vld [vmem:[%s3796_s14 + $0x50] sm:$0xff]  }
 0x2e4   : > { %1965 = vst [vmem:[#allocation5] sm:$0xff] %v1246_v32  ;;  %1961 = vst [vmem:[#allocation21] sm:$0xff] %v1246_v32  ;;  %2790 = vrcp.f32 %v1246_v32  ;;  %v2769_v32 = vld [vmem:[%s3796_s14 + $0x10] sm:$0xff]  }
 0x2e5   : > { %1963 = vst [vmem:[#allocation3] sm:$0xff] %v1244_v34  ;;  %1959 = vst [vmem:[#allocation18] sm:$0xff] %v1244_v34  ;;  %2792 = vrcp.f32 %v1239_v33  ;;  %v2770_v33 = vld [vmem:[%s3796_s14 + $0x58] sm:$0xff]  }
 0x2ee   : > { %v2791_v35 = vpop.eup %2790 }
 0x2ef   : > { %v1248_v36 = vmul.f32 %v2791_v35, %v1244_v34  ;;  %v2793_v37 = vpop.eup %2792  ;;  %v2771_v34 = vld [vmem:[%s3796_s14 + $0x18] sm:$0xff]   ;;  %v2772_v35 = vld [vmem:[%s3796_s14 + $0x60] sm:$0xff]  }
 0x2f1   : > { %v1249_v38 = vmul.f32 %v2793_v37, %v1248_v36  ;;  %v2773_v36 = vld [vmem:[%s3796_s14 + $0x20] sm:$0xff]   ;;  %v2774_v37 = vld [vmem:[%s3796_s14 + $0x68] sm:$0xff]  }
 0x2f3   : > { %2411 = vmatmul.mubr.f32.vlgmr.msra.gmra.mrb[4].mxu0 %v1249_v38  ;;  %1962 = vst [vmem:[#allocation2 + $0x8] sm:$0xff] %v1249_v38  ;;  %1958 = vst [vmem:[#allocation16] sm:$0xff] %v1249_v38 }
 0x2f4   : > { %1642 = vmatpush1.bf16.msra.mxu0 %v2716_v39  ;;  %1673 = vmatprep.mubr.bf16.mxu0 %v3144_v10  ;;  %v2776_v39 = vld [vmem:[%s3796_s14 + $0x70] sm:$0xff]  }
 0x2f5   : > { %1643 = vmatprep.subr.bf16.mxu0 %v2724_v42  ;;  %v2779_v42 = vld [vmem:[%s3796_s14 + $0x38] sm:$0xff]  }
 0x2f8   : > { %1644 = vmatpush1.bf16.msra.mxu0 %v2722_v43  ;;  %v3618_v43 = vld [vmem:[%s3795_s13] sm:$0xf] }
 0x2f9   : > { %1645 = vmatprep.subr.bf16.mxu0 %v2730_v44  ;;  %v1472_v44 = vrot.slane %v3618_v43, %v814_v62 }
 0x2fc   : > { %1646 = vmatpush1.bf16.msra.mxu0 %v2728_v45  ;;  %v1476_v45 = vrot.slane %v3618_v43, %v818_v60 }
 0x2fd   : > { %1647 = vmatprep.subr.bf16.mxu0 %v2736_v55 }
 0x300   : > { %1648 = vmatpush1.bf16.msra.mxu0 %v2734_v61 }
 0x301   : > { %1649 = vmatprep.subr.bf16.mxu0 %v2742_v1 }
 0x304   : > { %1650 = vmatpush1.bf16.msra.mxu0 %v2740_v0 }
 0x305   : > { %1651 = vmatprep.subr.bf16.mxu0 %v2748_v4 }
 0x308   : > { %1652 = vmatpush1.bf16.msra.mxu0 %v2746_v6 }
 0x309   : > { %1653 = vmatprep.subr.bf16.mxu0 %v2754_v8 }
 0x30c   : > { %1654 = vmatpush1.bf16.msra.mxu0 %v2752_v11 }
 0x30d   : > { %1655 = vmatprep.subr.bf16.mxu0 %v2760_v13 }
 0x310   : > { %1656 = vmatpush1.bf16.msra.mxu0 %v2758_v15 }
 0x311   : > { %2356 = vmatprep.subr.bf16.mxu0 %v2764_v27 }
 0x3c6   : > { %v1332_v46 = vpop.f32.mrb[4].mxu0 }
 0x3c7   : > { %v3559_v47 = vsub.f32 %v1249_v38, %v1332_v46  ;;  %v2412_v48 = vpop.f32.mrb[5].mxu0  ;;  %v2775_v38 = vld [vmem:[%s3796_s14 + $0x28] sm:$0xff]  }
 0x3c9   : > { %v1337_v50 = vmul.f32 %v3559_v47, %v3559_v47 }
 0x3cb   : > { %2446 = vmatmul.mubr.f32.vlgmr.msra.gmra.mrb[4].mxu1 %v1337_v50 }
 0x3cc   : > { %1683 = vmatpush1.bf16.msra.mxu1 %v2719_v49  ;;  %1714 = vmatprep.mubr.bf16.mxu1 %v3144_v10 }
 0x3cd   : > { %1684 = vmatprep.subr.bf16.mxu1 %v2727_v51 }
 0x3d0   : > { %1685 = vmatpush1.bf16.msra.mxu1 %v2725_v52 }
 0x3d1   : > { %1686 = vmatprep.subr.bf16.mxu1 %v2733_v53 }
 0x3d4   : > { %1687 = vmatpush1.bf16.msra.mxu1 %v2731_v54 }
 0x3d5   : > { %1688 = vmatprep.subr.bf16.mxu1 %v2739_v58 }
 0x3d8   : > { %1689 = vmatpush1.bf16.msra.mxu1 %v2737_v63 }
 0x3d9   : > { %1690 = vmatprep.subr.bf16.mxu1 %v2745_v3 }
 0x3dc   : > { %1691 = vmatpush1.bf16.msra.mxu1 %v2743_v2 }
 0x3dd   : > { %1692 = vmatprep.subr.bf16.mxu1 %v2751_v5 }
 0x3e0   : > { %1693 = vmatpush1.bf16.msra.mxu1 %v2749_v7 }
 0x3e1   : > { %1694 = vmatprep.subr.bf16.mxu1 %v2757_v9 }
 0x3e4   : > { %1695 = vmatpush1.bf16.msra.mxu1 %v2755_v12 }
 0x3e5   : > { %1696 = vmatprep.subr.bf16.mxu1 %v2763_v14 }
 0x3e8   : > { %1697 = vmatpush1.bf16.msra.mxu1 %v2761_v16 }
 0x49e   : > { %v1404_v17 = vpop.f32.mrb[4].mxu1 }
 0x49f   : > { %v1405_v18 = vadd.f32 1e-05, %v1404_v17  ;;  %v2447_v19 = vpop.f32.mrb[5].mxu1 }
 0x4a1   : > { %2794 = vrsqrt.f32 %v1405_v18 }
 0x4ab   : > { %v2795_v20 = vpop.eup %2794 }
 0x4ac   : > { %v1409_v22 = vmul.f32 %v2795_v20, %v3559_v47 }
 0x4ae   : > { %v1417_v24 = vmul.f32 %v2259_v21, %v1409_v22 }
 0x4b0   : > { %v1425_v25 = vadd.f32 %v2260_v23, %v1417_v24 }
 0x4b2   : > { %v1426_v26 = vpack.c.bf16 %v1425_v25, %v1425_v25 }
 0x4b4   : > { %1674 = vmatmul.mubr.bf16.vlgmr.msra.gmra.mrb[8].mxu0 %v1426_v26  ;;  %1715 = vmatmul.mubr.bf16.vlgmr.msra.gmra.mrb[8].mxu1 %v1426_v26 }
 0x4b5   : > { %2357 = vmatpush3.bf16.msra.mxu0 %v2765_v28 }
 0x4b6   : > { %2358 = vmatprep.subr.bf16.mxu0 %v2766_v29 }
 0x4b9   : > { %2359 = vmatpush3.bf16.msra.mxu0 %v2767_v30 }
 0x4ba   : > { %2360 = vmatprep.subr.bf16.mxu0 %v2768_v31 }
 0x4bd   : > { %2361 = vmatpush3.bf16.msra.mxu0 %v2769_v32 }
 0x4be   : > { %2362 = vmatprep.subr.bf16.mxu0 %v2770_v33 }
 0x4c1   : > { %2363 = vmatpush3.bf16.msra.mxu0 %v2771_v34  ;;  %v3145_v34 = vmov -1.0  }
 0x4c2   : > { %2364 = vmatprep.subr.bf16.mxu0 %v2772_v35 }
 0x4c5   : > { %2365 = vmatpush3.bf16.msra.mxu0 %v2773_v36 }
 0x4c6   : > { %2366 = vmatprep.subr.bf16.mxu0 %v2774_v37  ;;  %v1464_v37 = vrot.slane %v3618_v43, %v806_v59 }
 0x4c9   : > { %2367 = vmatpush3.bf16.msra.mxu0 %v2775_v38 }
 0x4ca   : > { %2368 = vmatprep.subr.bf16.mxu0 %v2776_v39 }
 0x4cd   : > { %2369 = vmatpush3.bf16.msra.mxu0 %v2777_v40  ;;  %v1468_v40 = vrot.slane %v3618_v43, %v810_v57 }
 0x4ce   : > { %2370 = vmatprep.subr.bf16.mxu0 %v2778_v41 }
 0x4d1   : > { %2371 = vmatpush3.bf16.msra.mxu0 %v2779_v42 }
 0x587   : > { %v3626_v46 = vpop.f32.mrb[8].mxu0  ;;  %v1716_v47 = vpop.f32.mrb[8].mxu1 }
 0x588   : > { %v1717_v48 = vadd.f32 %v1716_v47, %v1472_v44  ;;  %v3628_v49 = vpop.f32.mrb[9].mxu0  ;;  %v1718_v50 = vpop.f32.mrb[9].mxu1 }
 0x589   : > { %v1719_v51 = vadd.f32 %v1718_v50, %v1476_v45  ;;  %v1679_v52 = vpop.f32.mrb[10].mxu0  ;;  %v1720_v53 = vpop.f32.mrb[10].mxu1  ;;  %v1676_v50 = vadd.f32 %v3626_v46, %v1464_v37 }
 0x58a   : > { %v1725_v54 = vmul.f32 0.70710677, %v1717_v48  ;;  %v1680_v55 = vpop.f32.mrb[11].mxu0  ;;  %v1721_v58 = vpop.f32.mrb[11].mxu1  ;;  %v1723_v42 = vmul.f32 0.5, %v1717_v48  ;;  %v1678_v53 = vadd.f32 %v3628_v49, %v1468_v40 }
 0x58b   : > { %v1726_v61 = vmul.f32 0.70710677, %v1719_v51  ;;  %v1724_v45 = vmul.f32 0.5, %v1719_v51 }
 0x58c   : > { %v1731_v63 = vand.u32 2147483647, %v1725_v54  ;;  %vm1727_vm2 = vcmp.ge.f32.partialorder %v1725_v54, 0.0 }
 0x58d   : > { %v1732_v62 = vand.u32 2147483647, %v1726_v61  ;;  %vm1728_vm3 = vcmp.ge.f32.partialorder %v1726_v61, 0.0  ;;  %v1729_v35 = vsel %vm1727_vm2, 1.0, %v3145_v34 }
 0x58e   : > { %v1733_v0 = vmul.f32 0.3275911, %v1731_v63  ;;  %v1759_v3 = vsub.f32 0.0, %v1731_v63  ;;  %v1730_v39 = vsel %vm1728_vm3, 1.0, %v3145_v34 }
 0x58f   : > { %v1734_v1 = vmul.f32 0.3275911, %v1732_v62  ;;  %v1760_v4 = vsub.f32 0.0, %v1732_v62 }
 0x590   : > { %v1735_v2 = vadd.f32 1.0, %v1733_v0  ;;  %v1761_v6 = vmul.f32 %v1759_v3, %v1731_v63 }
 0x591   : > { %v1736_v60 = vadd.f32 1.0, %v1734_v1  ;;  %v1762_v9 = vmul.f32 %v1760_v4, %v1732_v62 }
 0x592   : > { %2796 = vrcp.f32 %v1735_v2  ;;  %v1763_v12 = vmul.f32 1.442695, %v1761_v6 }
 0x593   : > { %2798 = vrcp.f32 %v1736_v60  ;;  %v1765_v15 = vmul.f32 1.442695, %v1762_v9 }
 0x594   : > { %2800 = vpow2.f32 %v1763_v12 }
 0x595   : > { %2802 = vpow2.f32 %v1765_v15 }
 0x59c   : > { %v2797_v5 = vpop.eup %2796 }
 0x59d   : > { %v2799_v7 = vpop.eup %2798  ;;  %v1741_v8 = vmul.f32 1.0614054, %v2797_v5 }
 0x59e   : > { %v1742_v10 = vmul.f32 1.0614054, %v2799_v7  ;;  %v2801_v28 = vpop.eup %2800 }
 0x59f   : > { %v1743_v11 = vadd.f32 -1.4531521, %v1741_v8  ;;  %v2803_v30 = vpop.eup %2802 }
 0x5a0   : > { %v1744_v13 = vadd.f32 -1.4531521, %v1742_v10 }
 0x5a1   : > { %v1745_v14 = vmul.f32 %v2797_v5, %v1743_v11 }
 0x5a2   : > { %v1746_v16 = vmul.f32 %v2799_v7, %v1744_v13 }
 0x5a3   : > { %v1747_v17 = vadd.f32 1.4214138, %v1745_v14 }
 0x5a4   : > { %v1748_v18 = vadd.f32 1.4214138, %v1746_v16 }
 0x5a5   : > { %v1749_v19 = vmul.f32 %v2797_v5, %v1747_v17 }
 0x5a6   : > { %v1750_v20 = vmul.f32 %v2799_v7, %v1748_v18 }
 0x5a7   : > { %v1751_v21 = vadd.f32 -0.28449672, %v1749_v19 }
 0x5a8   : > { %v1752_v22 = vadd.f32 -0.28449672, %v1750_v20 }
 0x5a9   : > { %v1753_v23 = vmul.f32 %v2797_v5, %v1751_v21 }
 0x5aa   : > { %v1754_v24 = vmul.f32 %v2799_v7, %v1752_v22 }
 0x5ab   : > { %v1755_v25 = vadd.f32 0.2548296, %v1753_v23 }
 0x5ac   : > { %v1756_v26 = vadd.f32 0.2548296, %v1754_v24 }
 0x5ad   : > { %v1757_v27 = vmul.f32 %v2797_v5, %v1755_v25 }
 0x5ae   : > { %v1758_v29 = vmul.f32 %v2799_v7, %v1756_v26 }
 0x5af   : > { %v1767_v31 = vmul.f32 %v2801_v28, %v1757_v27 }
 0x5b0   : > { %v1768_v32 = vmul.f32 %v2803_v30, %v1758_v29 }
 0x5b1   : > { %v1769_v33 = vsub.f32 1.0, %v1767_v31 }
 0x5b2   : > { %v1770_v36 = vsub.f32 1.0, %v1768_v32 }
 0x5b3   : > { %v1771_v38 = vmul.f32 %v1769_v33, %v1729_v35 }
 0x5b4   : > { %v1772_v41 = vmul.f32 %v1770_v36, %v1730_v39 }
 0x5b5   : > { %v1773_v44 = vadd.f32 1.0, %v1771_v38 }
 0x5b6   : > { %v1774_v47 = vadd.f32 1.0, %v1772_v41 }
 0x5b7   : > { %v1775_v52 = vmul.f32 %v1773_v44, %v1723_v42 }
 0x5b8   : > { %v1776_v54 = vmul.f32 %v1774_v47, %v1724_v45 }
 0x5b9   : > { %v1777_v55 = vmul.f32 %v1775_v52, %v1676_v50 }
 0x5ba   : > { %v1778_v59 = vmul.f32 %v1776_v54, %v1678_v53 }
 0x5bb   : > { %v1779_v61 = vpack.c.bf16 %v1777_v55, %v1777_v55 }
 0x5bc   : > { %v1780_v58 = vpack.c.bf16 %v1778_v59, %v1778_v59 }
 0x5be   : > { %1948 = vmatprep.mubr.bf16.mxu0 %v1780_v58 }
 0x5bf   : > { %1949 = vmatmul.mubr.bf16.vlgmr.msra.gmra.mrb[12].mxu0 %v1779_v61 }
 0x5c0   : > { %2958 = shalt.err (!%p2955_p11)
}
 0x5c1   : > { %s2959_s4 = scalar_lea.hbm %s3799_s17, 128  ;;  %p3855_p10 = pmov %p3854_p0 }
 0x5c2   : > { %p2960_p9 = scmp.ne.s32.totalorder %s3799_s17, %s2959_s4  ;;  %p2965_p7 = scmp.lt.u32.totalorder %s2959_s4, %s3799_s17 }
 0x5c4   : > { %p2961_p4 = pnand %p2960_p9, %p3855_p10 }
 0x5c6   : > { %p2962_p13 = pneg %p2961_p4 }
 0x5c8   : > { %p2967_p8 = pnand %p2965_p7, %p2962_p13 }
 0x5ca   : > { %2970 = shalt.err (!%p2967_p8)
}
 0x5cb   : > { %p3856_p12 = pmov %p3854_p0  ;;  %s2971_s23 = scalar_lea.vmem %s3638_s20, 128 }
 0x5cc   : > { %p2972_p0 = scmp.ne.s32.totalorder %s3638_s20, %s2971_s23  ;;  %p3857_p3 = pmov %p3855_p10 }
 0x5cd   : > { %2518 = dma.vmem_to_hbm [thread:$0]  (%p3856_p12), %s1992_s29, 128, %s3799_s17, [#allocation17]  }
 0x5ce   : > { %p2973_p2 = pnand %p2972_p0, %p3857_p3  ;;  %p2978_p5 = scmp.lt.s32.totalorder %s3638_s20, %s3638_s20 }
 0x5cf   : > { %p2979_p1 = scmp.lt.s32.totalorder %s2971_s23, %s2971_s23 }
 0x5d0   : > { %p2974_p6 = pneg %p2973_p2 }
 0x5d1   : > { %p2980_p11 = por %p2979_p1, %p2978_p5 }
 0x5d3   : > { %p2981_p9 = pnand %p2980_p11, %p2974_p6 }
 0x5d5   : > { %2984 = shalt.err (!%p2981_p9)
}
 0x5d6   : > { %s2985_s26 = scalar_lea.hbm %s3801_s19, 128  ;;  %p3858_p4 = pmov %p3857_p3 }
 0x5d7   : > { %p2986_p10 = scmp.ne.s32.totalorder %s3801_s19, %s2985_s26  ;;  %p2991_p8 = scmp.lt.u32.totalorder %s2985_s26, %s3801_s19 }
 0x5d9   : > { %p2987_p13 = pnand %p2986_p10, %p3858_p4 }
 0x5db   : > { %p2988_p7 = pneg %p2987_p13 }
 0x5dd   : > { %p2993_p12 = pnand %p2991_p8, %p2988_p7 }
 0x5df   : > { %2996 = shalt.err (!%p2993_p12)
}
 0x5e0   : > { %p3859_p0 = pmov %p3857_p3  ;;  %s3148_s27 = smov [#allocation18]  }
 0x5e1   : > { %s2002_s18 = sshll.u32 %s3148_s27, 4  ;;  %s3149_s23 = smov [#allocation21]   ;;  %s2003_s18 = int_to_ptr.vmem [resolvable:$true] %s2002_s18 }
 0x5e2   : > { %2522 = dma.vmem_to_hbm [thread:$0]  (%p3859_p0), %s3638_s20, 128, %s3801_s19, [#allocation20]  }
 0x5e3   : > { %s2024_s25 = sshll.u32 %s3149_s23, 4  ;;  %s2997_s3 = scalar_lea.vmem %s2003_s18, 128  ;;  %s2025_s25 = int_to_ptr.vmem [resolvable:$true] %s2024_s25 }
 0x5e4   : > { %p2998_p3 = scmp.ne.s32.totalorder %s2003_s18, %s2997_s3  ;;  %p3860_p2 = pmov %p3859_p0 }
 0x5e5   : > { %p3004_p1 = scmp.lt.s32.totalorder %s2003_s18, %s2003_s18  ;;  %p3005_p11 = scmp.lt.s32.totalorder %s2997_s3, %s2997_s3 }
 0x5e6   : > { %p2999_p6 = pnand %p2998_p3, %p3860_p2 }
 0x5e7   : > { %p3006_p9 = por %p3005_p11, %p3004_p1 }
 0x5e8   : > { %p3000_p5 = pneg %p2999_p6 }
 0x5ea   : > { %p3007_p10 = pnand %p3006_p9, %p3000_p5 }
 0x5ec   : > { %3010 = shalt.err (!%p3007_p10)
}
 0x5ed   : > { %s3861_s24 = sld [smem:[#allocation42_spill]]  ;;  %p3863_p13 = pmov %p3859_p0 }
 0x5f3   : > { %s3862_s29 = smov %s3861_s24  ;;  %s3011_s20 = scalar_lea.hbm %s3861_s24, 128 }
 0x5f4   : > { %p3012_p4 = scmp.ne.s32.totalorder %s3862_s29, %s3011_s20  ;;  %p3017_p12 = scmp.lt.u32.totalorder %s3011_s20, %s3862_s29 }
 0x5f6   : > { %p3013_p7 = pnand %p3012_p4, %p3863_p13 }
 0x5f8   : > { %p3014_p8 = pneg %p3013_p7 }
 0x5fa   : > { %p3019_p0 = pnand %p3017_p12, %p3014_p8 }
 0x5fc   : > { %3022 = shalt.err (!%p3019_p0)
}
 0x5fd   : > { %p3864_p3 = pmov %p3860_p2  ;;  %s3023_s26 = scalar_lea.vmem %s2025_s25, 128 }
 0x5fe   : > { %p3024_p2 = scmp.ne.s32.totalorder %s2025_s25, %s3023_s26  ;;  %p3030_p11 = scmp.lt.s32.totalorder %s2025_s25, %s2025_s25 }
 0x5ff   : > { %2520 = dma.vmem_to_hbm [thread:$0]  (%p3864_p3), %s2003_s18, 128, %s3862_s29, [#allocation17]  }
 0x600   : > { %p3865_p6 = pmov %p3864_p3  ;;  %p3031_p9 = scmp.lt.s32.totalorder %s3023_s26, %s3023_s26 }
 0x602   : > { %p3025_p5 = pnand %p3024_p2, %p3865_p6  ;;  %p3032_p10 = por %p3031_p9, %p3030_p11 }
 0x604   : > { %p3026_p1 = pneg %p3025_p5 }
 0x606   : > { %p3033_p4 = pnand %p3032_p10, %p3026_p1 }
 0x608   : > { %3036 = shalt.err (!%p3033_p4)
}
 0x609   : > { %s3866_s20 = sld [smem:[#allocation43_spill]]  ;;  %p3867_p7 = pmov %p3864_p3 }
 0x60f   : > { %s3037_s1 = scalar_lea.hbm %s3866_s20, 128 }
 0x610   : > { %p3038_p13 = scmp.ne.s32.totalorder %s3866_s20, %s3037_s1  ;;  %p3043_p0 = scmp.lt.u32.totalorder %s3037_s1, %s3866_s20 }
 0x612   : > { %p3039_p8 = pnand %p3038_p13, %p3867_p7 }
 0x614   : > { %p3040_p12 = pneg %p3039_p8 }
 0x616   : > { %p3045_p3 = pnand %p3043_p0, %p3040_p12 }
 0x618   : > { %3048 = shalt.err (!%p3045_p3)
}
 0x619   : > { %p3868_p2 = pmov %p3865_p6  ;;  %s3869_s24 = sld [smem:[#allocation40_spill]]  ;;  %v2804_v63 = vld [vmem:[%s3464_s0] sm:$0xff] }
 0x61a   : > { %s3870_s21 = sld [smem:[#allocation33_spill]]  ;;  %s2311_s1 = sshll.u32 %s3277_s2, 7 }
 0x61b   : > { %2524 = dma.vmem_to_hbm [thread:$0]  (%p3868_p2), %s2025_s25, 128, %s3866_s20, [#allocation20]  }
 0x61c   : > { %s1980_s15 = sshll.u32 %s670_s28, 4  ;;  %s3871_s23 = sld [smem:[#allocation41_spill]]  ;;  %s3729_s15 = int_to_ptr.vmem [resolvable:$true] %s1980_s15 }
 0x61d   : > { %s1967_s26 = scalar_lea.sflag [#allocation8], %s668_s16  ;;  %s3049_s4 = scalar_lea.vmem %s3729_s15, 128 }
 0x61e   : > { %p3050_p6 = scmp.ne.s32.totalorder %s3729_s15, %s3049_s4  ;;  %s3150_s0 = smov [#allocation15]  }
 0x61f   : > { %v2293_v57 = vld [vmem:[%s3869_s24] ss:$0 sm:$0xff]  ;;  %s3053_s24 = sshll.u32 %s3150_s0, 4  ;;  %s3054_s24 = int_to_ptr.vmem [resolvable:$false] %s3053_s24 }
 0x620   : > { %p3873_p5 = scmp.ne.s32.totalorder %s3870_s21, 0  ;;  %p3056_p9 = scmp.lt.s32.totalorder %s3729_s15, %s3054_s24 }
 0x622   : > { %s3872_s3 = smov %s3871_s23  ;;  %s3727_s25 = scalar_lea.hbm %s3871_s23, %s2311_s1 }
 0x623   : > { %p3051_p1 = pnand %p3050_p6, %p3873_p5  ;;  %s3055_s1 = scalar_lea.vmem %s3054_s24, 256 }
 0x624   : > { %p3057_p10 = scmp.lt.s32.totalorder %s3055_s1, %s3049_s4 }
 0x625   : > { %p3052_p11 = pneg %p3051_p1 }
 0x626   : > { %p3058_p4 = por %p3057_p10, %p3056_p9 }
 0x628   : > { %p3059_p13 = pnand %p3058_p4, %p3052_p11 }
 0x692   : > { %v2372_v56 = vpop.f32.mrb[12].mxu0 }
 0x693   : > { %v2373_v43 = vpop.f32.mrb[13].mxu0 }
 0x694   : > { %v2374_v46 = vadd.f32 %v2373_v43, %v2372_v56  ;;  %v2375_v48 = vpop.f32.mrb[14].mxu0 }
 0x695   : > { %v2376_v49 = vpop.f32.mrb[15].mxu0 }
 0x696   : > { %v1951_v51 = vadd.f32 %v2374_v46, %v2293_v57 }
 0x698   : > { %v1956_v62 = vadd.f32 %v2804_v63, %v1951_v51 }
 0x69a   : > { %1957 = vst.msk [vmem:[%s670_s28] sm:$0xff] %vm699_vm0, %v1956_v62 }
 0x69b   : > { %3062 = shalt.err (!%p3059_p13)
}
 0x69c   : > { %s3063_s16 = scalar_lea.hbm %s3727_s25, 128  ;;  %s3067_s18 = scalar_lea.hbm %s3872_s3, 1024 }
 0x69d   : > { %p3064_p7 = scmp.ne.s32.totalorder %s3727_s25, %s3063_s16  ;;  %p3068_p0 = scmp.lt.u32.totalorder %s3727_s25, %s3872_s3 }
 0x69e   : > { %p3069_p3 = scmp.lt.u32.totalorder %s3067_s18, %s3063_s16  ;;  %p3071_p6 = scmp.lt.u32.totalorder %s3063_s16, %s3727_s25 }
 0x69f   : > { %p3065_p8 = pnand %p3064_p7, %p3873_p5 }
 0x6a0   : > { %p3070_p2 = por %p3069_p3, %p3068_p0 }
 0x6a1   : > { %p3066_p12 = pneg %p3065_p8 }
 0x6a2   : > { %p3072_p1 = por %p3071_p6, %p3070_p2 }
 0x6a4   : > { %p3073_p11 = pnand %p3072_p1, %p3066_p12 }
 0x6a6   : > { %3076 = shalt.err (!%p3073_p11)
}
 0x6a7   : > { %2516 = dma.vmem_to_hbm [thread:$0]  (%p3873_p5), %s3729_s15, 128, %s3727_s25, %s1967_s26  }
 0x6a8   : > { %p3874_p9 = scmp.eq.s32.totalorder %s3277_s2, 7 }
 0x6aa   : > { %3106 = dma.done.wait (%p3874_p9), [#allocation17], 256   ;;  %p3875_p10 = pmov %p3874_p9 }
 0x6ab   : > { %p3876_p4 = pmov %p3874_p9 }
 0x6ac   : > { %3108 = vsyncadd (%p3875_p10), [#allocation17], 4294967040 }
 0x6ad   : > { %3110 = dma.done.wait (%p3876_p4), [#allocation20], 256   ;;  %p3877_p13 = pmov %p3876_p4 }
 0x6af   : > { %3112 = vsyncadd (%p3877_p13), [#allocation20], 4294967040 }
 0x6b0 PF: > { %s3878_s4 = sld [smem:[#allocation30_spill]]  ;;  %s3879_s0 = sld [smem:[#allocation28_spill]] }
 0x6b1   : > { %s3880_s24 = sld [smem:[#allocation34_spill]] }
 0x6b6   : > { %p2572_p7 = scmp.ge.s32.totalorder %s3878_s4, 2  ;;  %s2052_s21 = sand.u32 1, %s3879_s0  }
 0x6b7   : > { %p3881_p8 = scmp.ne.s32.totalorder %s3880_s24, 0  ;;  %s2053_s15 = scalar_lea.sflag [#allocation8], %s2052_s21 }
 0x6b9   : > { %p2551_p12 = pnand %p2572_p7, %p3881_p8 }
 0x6bb   : > { %3114 = dma.done.wait (!%p2551_p12), %s2053_s15, 128  }
 0x6bc   : > { %3116 = vsyncadd (!%p2551_p12), %s2053_s15, 4294967168  ;;  %s3882_s24 = sld [smem:[#allocation31_spill]]  ;;  %s3883_s25 = sld [smem:[#allocation29_spill]] }
 0x6bd   : > { %s3884_s23 = sld [smem:[#allocation32_spill]]  ;;  %s3885_s1 = smov %s3123_s22 }
 0x6c2   : > { %p36_p5 = scmp.ge.s32.totalorder %s3882_s24, 10   ;;  %s3886_s22 = smov %s3883_s25 }
 0x6c4   :  { %38 = sbr.rel (!%p36_p5) target bundleno = 18 (0x12), region = 176 }
 0x6cb   :  { %2058 = vsyncpa [#allocation7], 1 }
 0x6cc   :  { %2060 = vsyncpa [#allocation7 + $0x1], 1 }
 0x6cd   :  { %2061 = vsyncpa [#allocation10], 1 }
 0x6ce   :  { %2062 = vsyncpa [#allocation13], 1 }
 0x6cf   :  { %2063 = vsyncpa [#allocation8], 1 }
 0x6d0   :  { %2065 = vsyncpa [#allocation8 + $0x1], 1 }
 0x6d1   :  { %2066 = vsyncpa [#allocation17], 1 }
 0x6d2   :  { %2067 = vsyncpa [#allocation20], 1 }

</bundles_post_ra>
